<compile_context>
chip_gen: v5e
topology: v5e:2x2
jax: 0.10.0
libtpu: 0.0.40
codegen_flags: <defaults>
</compile_context>

<pallas_src>
import math

import jax
import jax.numpy as jnp
from jax import lax
from jax.experimental import pallas as pl
from jax.experimental.pallas import tpu as pltpu


# Matmul operand dtype AT REST (weights stored in it, activations cast once in
# the wrapper).  Flip to jnp.bfloat16 on v5e/v6e/v7x for MXU throughput and
# halved HBM traffic; elementwise softmax math stays f32 either way.  Kept f32
# here so the f32 reference check below holds tightly.
_MM_DTYPE = jnp.float32


# ---------------------------------------------------------------------------
# Fused kernel: per-head QKV projection -> exp-softmax SDPA -> additive
# attention pooling.  One batch per grid step.
#
#   wqkv: (H, d_model, 3*HP)   per-head [q|k|v] weights, each span padded to
#                              HP=128 lanes, 1/sqrt(d_k) folded into the q part
#   bqkv: (H, 1, 3*HP)
#   w1  : (H, HP, hidden_pad)  additive-attention fc1, padded with zero rows
#   amask: (1, 1, Lk)          key mask (broadcast over query rows)
#   pmask: (1, Lq, 1)          pooling mask (zero for station rows)
#   out : (1, H, HP)           pooled vector per head, 128-lane dense store
# ---------------------------------------------------------------------------
def _text_seg_kernel(x_ref, amask_ref, pmask_ref, wqkv_ref, bqkv_ref,
                     w1_ref, b1_ref, w2_ref, b2_ref, o_ref, ctx_sc):
    n_heads = wqkv_ref.shape[0]
    hp = wqkv_ref.shape[2] // 3
    lq = x_ref.shape[1]
    hidden_pad = w1_ref.shape[2]

    x = x_ref[0]                      # (Lq, d_model), _MM_DTYPE at rest
    amask = amask_ref[0]              # (1, Lk) key mask

    def head_body(h, e_acc):
        w = wqkv_ref[h]               # (d_model, 3*HP), lane-aligned q|k|v spans
        b = bqkv_ref[h]               # (1, 3*HP)
        qkv = jnp.dot(x, w, preferred_element_type=jnp.float32) + b
        q = qkv[:, :hp]               # 1/sqrt(d_k) already folded into Wq/bq
        k = qkv[:, hp:2 * hp]
        v = qkv[:, 2 * hp:]
        s = jnp.dot(q, k.T, preferred_element_type=jnp.float32)      # (Lq, Lk)
        p = jnp.exp(s) * amask        # no max-sub (matches torch); mask after exp
        inv_den = pl.reciprocal(
            jnp.sum(p, axis=-1, keepdims=True) + 1e-8, approx=True)  # (Lq, 1)
        ctx = jnp.dot(p, v, preferred_element_type=jnp.float32) * inv_den
        ctx_sc[h] = ctx                                              # (Lq, HP)
        # accumulate additive-attention fc1 (zero-padded rows keep it exact)
        return e_acc + jnp.dot(ctx, w1_ref[h],
                               preferred_element_type=jnp.float32)

    e_pre = lax.fori_loop(0, n_heads, head_body,
                          jnp.zeros((lq, hidden_pad), jnp.float32),
                          unroll=True)

    # Additive attention pooling epilogue (pool mask zeroes station rows).
    e = jnp.tanh(e_pre + b1_ref[...])                                # (Lq, Hpad)
    logits = jnp.sum(e * w2_ref[...], axis=-1, keepdims=True) + b2_ref[...]
    alpha = jnp.exp(logits) * pmask_ref[0]                           # (Lq, 1)
    inv_dp = pl.reciprocal(
        jnp.sum(alpha, axis=0, keepdims=True) + 1e-8, approx=True)   # (1, 1)
    rows = [jnp.sum(ctx_sc[h] * alpha, axis=0, keepdims=True)        # (1, HP)
            for h in range(n_heads)]
    pooled = jnp.concatenate(rows, axis=0)                           # (H, HP)
    o_ref[0] = (pooled * inv_dp).astype(o_ref.dtype)


# ---------------------------------------------------------------------------
# TextEncoder module: parameter container + fused-kernel wrapper.
# ---------------------------------------------------------------------------
class TextEncoderPallas:
    """TextEncoder (BusLm) forward with MHA + additive pooling fused in Pallas."""
    D_K = D_V = 20  # fixed inside the PyTorch TextEncoder

    def __init__(self, bus_num, seg_num, word_embedding_dim,
                 num_attention_heads, query_vector_dim, key):
        self.bus_num, self.seg_num = bus_num, seg_num
        self.d_model = word_embedding_dim
        self.n_heads = num_attention_heads
        self.d_k, self.d_v = self.D_K, self.D_V
        self.hidden = query_vector_dim

        H, dk, dv, dm = self.n_heads, self.d_k, self.d_v, self.d_model
        hp = -(-max(dk, dv) // 128) * 128          # per-head lane pad (>=128)
        hidden_pad = -(-query_vector_dim // 128) * 128
        self.head_pad, self.hidden_pad = hp, hidden_pad

        ks = jax.random.split(key, 10)

        def xavier(k, fan_in, fan_out):
            a = math.sqrt(6.0 / (fan_in + fan_out))
            return jax.random.uniform(k, (fan_in, fan_out), jnp.float32, -a, a)

        def bias(k, fan_in, fan_out):
            a = 1.0 / math.sqrt(fan_in)
            return jax.random.uniform(k, (1, fan_out), jnp.float32, -a, a)

        # Raw parameters (faithful mirror of the torch Linears) -- kept for the
        # pure-JAX reference used in the self-check.
        self.Wq = xavier(ks[0], dm, H * dk); self.bq = bias(ks[1], dm, H * dk)
        self.Wk = xavier(ks[2], dm, H * dk); self.bk = bias(ks[3], dm, H * dk)
        self.Wv = xavier(ks[4], dm, H * dv); self.bv = bias(ks[5], dm, H * dv)
        self.W1 = xavier(ks[6], H * dv, query_vector_dim)
        self.b1 = bias(ks[7], H * dv, query_vector_dim)
        a2 = math.sqrt(6.0 / (query_vector_dim + 1))
        self.w2 = jax.random.uniform(ks[8], (1, query_vector_dim),
                                     jnp.float32, -a2, a2)
        b2a = 1.0 / math.sqrt(query_vector_dim)
        self.b2 = jax.random.uniform(ks[9], (1, 1), jnp.float32, -b2a, b2a)

        # -- Kernel-layout parameters (built once, host-side) ---------------
        # Head axis leading, each head's q|k|v span padded to 128 lanes, and
        # the 1/sqrt(d_k) score scale folded into the query projection.
        inv = 1.0 / math.sqrt(dk)

        def pad_cols(m, width):
            return jnp.pad(m, ((0, 0), (0, width - m.shape[1])))

        w_heads, b_heads, w1_heads = [], [], []
        for h in range(H):
            wq = pad_cols(self.Wq[:, h * dk:(h + 1) * dk] * inv, hp)
            wk = pad_cols(self.Wk[:, h * dk:(h + 1) * dk], hp)
            wv = pad_cols(self.Wv[:, h * dv:(h + 1) * dv], hp)
            w_heads.append(jnp.concatenate([wq, wk, wv], axis=1))
            bqh = pad_cols(self.bq[:, h * dk:(h + 1) * dk] * inv, hp)
            bkh = pad_cols(self.bk[:, h * dk:(h + 1) * dk], hp)
            bvh = pad_cols(self.bv[:, h * dv:(h + 1) * dv], hp)
            b_heads.append(jnp.concatenate([bqh, bkh, bvh], axis=1))
            w1_heads.append(jnp.pad(
                self.W1[h * dv:(h + 1) * dv, :],
                ((0, hp - dv), (0, hidden_pad - query_vector_dim))))

        # bf16-at-rest ready: the dominant matmul operand is stored in _MM_DTYPE.
        self.Wqkv = jnp.stack(w_heads).astype(_MM_DTYPE)      # (H, dm, 3*HP)
        self.bqkv = jnp.stack(b_heads)                        # (H, 1, 3*HP) f32
        self.W1p = jnp.stack(w1_heads)                        # (H, HP, hidden_pad)
        self.b1p = jnp.pad(self.b1,
                           ((0, 0), (0, hidden_pad - query_vector_dim)))
        self.w2p = jnp.pad(self.w2,
                           ((0, 0), (0, hidden_pad - query_vector_dim)))

    # ----- one fused pallas_call per segment -------------------------------
    def _encode_segment(self, x, attn_mask, pool_mask):
        B, Lq, dm = x.shape
        H, hp = self.n_heads, self.head_pad
        amask = attn_mask.astype(jnp.float32).reshape(B, 1, Lq)
        pmask = pool_mask.astype(jnp.float32).reshape(B, Lq, 1)
        x = x.astype(_MM_DTYPE)       # cast-at-rest, not per-op in the kernel

        out = pl.pallas_call(
            _text_seg_kernel,
            out_shape=jax.ShapeDtypeStruct((B, H, hp), jnp.float32),
            grid_spec=pltpu.PrefetchScalarGridSpec(
                num_scalar_prefetch=0,
                grid=(B,),
                in_specs=[
                    pl.BlockSpec((1, Lq, dm), lambda b: (b, 0, 0)),
                    pl.BlockSpec((1, 1, Lq), lambda b: (b, 0, 0)),
                    pl.BlockSpec((1, Lq, 1), lambda b: (b, 0, 0)),
                    # constant index maps -> weights stay VMEM-resident
                    pl.BlockSpec(self.Wqkv.shape, lambda b: (0, 0, 0)),
                    pl.BlockSpec(self.bqkv.shape, lambda b: (0, 0, 0)),
                    pl.BlockSpec(self.W1p.shape, lambda b: (0, 0, 0)),
                    pl.BlockSpec(self.b1p.shape, lambda b: (0, 0)),
                    pl.BlockSpec(self.w2p.shape, lambda b: (0, 0)),
                    pl.BlockSpec(self.b2.shape, lambda b: (0, 0)),
                ],
                out_specs=pl.BlockSpec((1, H, hp), lambda b: (b, 0, 0)),
                scratch_shapes=[pltpu.VMEM((H, Lq, hp), jnp.float32)],
            ),
            compiler_params=pltpu.CompilerParams(
                dimension_semantics=("parallel",)),
        )(x, amask, pmask, self.Wqkv, self.bqkv,
          self.W1p, self.b1p, self.w2p, self.b2)

        # Crop the 128-lane per-head pad to d_v and flatten heads (tiny array).
        return out[:, :, :self.d_v].reshape(B, H * self.d_v)

    def __call__(self, last_hidden_states, token_masks, seg_masks):
        # TODO(synk): the pretrained `bert_model` has no in-script Pallas
        # equivalent; its per-segment hidden states are taken as inputs here.
        # Dropout is identity in eval mode and therefore omitted.
        if self.bus_num > 0:
            new_masks = []
            for seg_idx, m in enumerate(token_masks):
                m = jnp.concatenate([seg_masks, m], axis=-1)
                m = m.at[:, seg_idx].set(0.0)
                new_masks.append(m)
            token_masks = tuple(new_masks)
            station_emb = jnp.concatenate(
                [last_hidden_states[i][:, :1] for i in range(self.bus_num)],
                axis=1)
            outs = []
            for seg_idx in range(self.seg_num):
                seg_hidden = jnp.concatenate(
                    [station_emb, last_hidden_states[seg_idx]], axis=-2)
                am = token_masks[seg_idx]                 # (B, bus_num + L)
                pm = am.at[:, :self.bus_num].set(0.0)     # pool word tokens only
                outs.append(self._encode_segment(seg_hidden, am, pm))
            return tuple(outs)
        else:
            outs = []
            for seg_idx in range(self.seg_num):
                am = token_masks[seg_idx]
                outs.append(self._encode_segment(
                    last_hidden_states[seg_idx], am, am))
            return tuple(outs)


# ---------------------------------------------------------------------------
# Pure-JAX references (mirror the PyTorch forward exactly) for verification.
# ---------------------------------------------------------------------------
def mha_reference(enc, x, mask=None):
    B, L, _ = x.shape
    H, dk, dv = enc.n_heads, enc.d_k, enc.d_v
    q_s = (x @ enc.Wq + enc.bq).reshape(B, L, H, dk).transpose(0, 2, 1, 3)
    k_s = (x @ enc.Wk + enc.bk).reshape(B, L, H, dk).transpose(0, 2, 1, 3)
    v_s = (x @ enc.Wv + enc.bv).reshape(B, L, H, dv).transpose(0, 2, 1, 3)
    scores = jnp.exp(q_s @ jnp.swapaxes(k_s, -1, -2) / math.sqrt(dk))
    if mask is not None:
        scores = scores * mask[:, None, None, :]
    attn = scores / (jnp.sum(scores, -1, keepdims=True) + 1e-8)
    ctx = attn @ v_s
    return ctx.transpose(0, 2, 1, 3).reshape(B, L, H * dv)


def additive_reference(enc, x, attn_mask=None):
    e = jnp.tanh(x @ enc.W1 + enc.b1)
    alpha = jnp.exp(e @ enc.w2.T + enc.b2)
    if attn_mask is not None:
        alpha = alpha * attn_mask[:, :, None]
    alpha = alpha / (jnp.sum(alpha, axis=1, keepdims=True) + 1e-8)
    return jnp.sum(x * alpha, axis=1)


def text_encoder_reference(enc, last_hidden_states, token_masks, seg_masks):
    if enc.bus_num > 0:
        new_masks = []
        for seg_idx, m in enumerate(token_masks):
            m = jnp.concatenate([seg_masks, m], axis=-1)
            m = m.at[:, seg_idx].set(0.0)
            new_masks.append(m)
        token_masks = tuple(new_masks)
        station_emb = jnp.concatenate(
            [last_hidden_states[i][:, :1] for i in range(enc.bus_num)], axis=1)
        outs = []
        for seg_idx in range(enc.seg_num):
            seg_hidden = jnp.concatenate(
                [station_emb, last_hidden_states[seg_idx]], axis=-2)
            prop = mha_reference(enc, seg_hidden, token_masks[seg_idx])
            vec = additive_reference(enc, prop[:, enc.bus_num:],
                                     token_masks[seg_idx][:, enc.bus_num:])
            outs.append(vec)
        return tuple(outs)
    else:
        outs = []
        for seg_idx in range(enc.seg_num):
            prop = mha_reference(enc, last_hidden_states[seg_idx],
                                 token_masks[seg_idx])
            vec = additive_reference(enc, prop, token_masks[seg_idx])
            outs.append(vec)
        return tuple(outs)


# ---------------------------------------------------------------------------
if __name__ == "__main__":
    # Small shapes consistent with the module.
    B, L, d_model = 2, 8, 32          # batch, words per segment, embedding dim
    n_heads, qdim = 4, 16             # attention heads, query_vector_dim
    seg_num = bus_num = 2

    key = jax.random.PRNGKey(0)
    k_enc, k_enc0, k_hid = jax.random.split(key, 3)

    enc = TextEncoderPallas(bus_num, seg_num, d_model, n_heads, qdim, key=k_enc)

    # Stand-in for the BERT hidden states (one per segment).
    hid_keys = jax.random.split(k_hid, seg_num)
    last_hidden_states = tuple(
        jax.random.normal(k, (B, L, d_model), jnp.float32) for k in hid_keys)

    # Deterministic masks: mostly ones with a few zeroed tokens.
    tm0 = jnp.ones((B, L), jnp.float32).at[:, L - 1].set(0.0)
    tm1 = jnp.ones((B, L), jnp.float32).at[0, 3].set(0.0)
    token_masks = (tm0, tm1)
    seg_masks = jnp.ones((B, bus_num), jnp.float32).at[1, 1].set(0.0)

    # Tolerance loosened from exact-f32 because pl.reciprocal(approx=True) is
    # used for both softmax denominators (EUP slot).
    RTOL = ATOL = 1e-2

    outs = jax.block_until_ready(enc(last_hidden_states, token_masks, seg_masks))
    refs = text_encoder_reference(enc, last_hidden_states, token_masks, seg_masks)
    assert len(outs) == seg_num
    for o, r in zip(outs, refs):
        assert o.shape == (B, n_heads * TextEncoderPallas.D_V), o.shape
        assert jnp.allclose(o, r, rtol=RTOL, atol=ATOL), \
            float(jnp.max(jnp.abs(o - r)))

    # Also exercise the bus_num == 0 branch.
    enc0 = TextEncoderPallas(0, seg_num, d_model, n_heads, qdim, key=k_enc0)
    outs0 = jax.block_until_ready(enc0(last_hidden_states, token_masks, seg_masks))
    refs0 = text_encoder_reference(enc0, last_hidden_states, token_masks, seg_masks)
    for o, r in zip(outs0, refs0):
        assert o.shape == (B, n_heads * TextEncoderPallas.D_V), o.shape
        assert jnp.allclose(o, r, rtol=RTOL, atol=ATOL), \
            float(jnp.max(jnp.abs(o - r)))

    print("KERNEL_OK")
</pallas_src>

<mosaic_0001>
module attributes {stable_mosaic.version = 11 : i64} {
  func.func @_text_seg_kernel(%arg0: i32, %arg1: memref<1x10x32xf32, #tpu.memory_space<vmem>>, %arg2: memref<1x1x10xf32, #tpu.memory_space<vmem>>, %arg3: memref<1x10x1xf32, #tpu.memory_space<vmem>>, %arg4: memref<4x32x384xf32, #tpu.memory_space<vmem>>, %arg5: memref<4x1x384xf32, #tpu.memory_space<vmem>>, %arg6: memref<4x128x128xf32, #tpu.memory_space<vmem>>, %arg7: memref<1x128xf32, #tpu.memory_space<vmem>>, %arg8: memref<1x128xf32, #tpu.memory_space<vmem>>, %arg9: memref<1x1xf32, #tpu.memory_space<vmem>>, %arg10: memref<1x4x128xf32, #tpu.memory_space<vmem>>, %arg11: memref<4x10x128xf32, #tpu.memory_space<vmem>>) attributes {dimension_semantics = [#tpu.dimension_semantics<parallel>], iteration_bounds = array<i64: 2>, scalar_prefetch = 0 : i64, scratch_operands = 1 : i64, tpu.core_type = #tpu.core_type<tc>, window_params = [{transform_indices = @transform_0, window_bounds = array<i64: 1, 10, 32>}, {transform_indices = @transform_1, window_bounds = array<i64: 1, 1, 10>}, {transform_indices = @transform_2, window_bounds = array<i64: 1, 10, 1>}, {pipeline_mode = #tpu.pipeline_mode<synchronous>, transform_indices = @transform_3, window_bounds = array<i64: 4, 32, 384>}, {pipeline_mode = #tpu.pipeline_mode<synchronous>, transform_indices = @transform_4, window_bounds = array<i64: 4, 1, 384>}, {pipeline_mode = #tpu.pipeline_mode<synchronous>, transform_indices = @transform_5, window_bounds = array<i64: 4, 128, 128>}, {pipeline_mode = #tpu.pipeline_mode<synchronous>, transform_indices = @transform_6, window_bounds = array<i64: 1, 128>}, {pipeline_mode = #tpu.pipeline_mode<synchronous>, transform_indices = @transform_7, window_bounds = array<i64: 1, 128>}, {pipeline_mode = #tpu.pipeline_mode<synchronous>, transform_indices = @transform_8, window_bounds = array<i64: 1, 1>}, {transform_indices = @transform_9, window_bounds = array<i64: 1, 4, 128>}]} {
    %c0 = arith.constant 0 : index
    %c0_0 = arith.constant 0 : index
    %c0_1 = arith.constant 0 : index
    %0 = vector.load %arg1[%c0, %c0_0, %c0_1] : memref<1x10x32xf32, #tpu.memory_space<vmem>>, vector<1x10x32xf32>
    %1 = vector.shape_cast %0 : vector<1x10x32xf32> to vector<10x32xf32>
    %c0_2 = arith.constant 0 : index
    %c0_3 = arith.constant 0 : index
    %c0_4 = arith.constant 0 : index
    %2 = vector.load %arg2[%c0_2, %c0_3, %c0_4] : memref<1x1x10xf32, #tpu.memory_space<vmem>>, vector<1x1x10xf32>
    %3 = vector.shape_cast %2 : vector<1x1x10xf32> to vector<1x10xf32>
    %cst = arith.constant 0.000000e+00 : f32
    %4 = vector.broadcast %cst : f32 to vector<10x128xf32>
    %c0_i32 = arith.constant 0 : i32
    %5 = arith.index_cast %c0_i32 : i32 to index
    %c0_5 = arith.constant 0 : index
    %c0_6 = arith.constant 0 : index
    %6 = vector.load %arg4[%5, %c0_5, %c0_6] : memref<4x32x384xf32, #tpu.memory_space<vmem>>, vector<1x32x384xf32>
    %7 = vector.shape_cast %6 : vector<1x32x384xf32> to vector<32x384xf32>
    %8 = arith.index_cast %c0_i32 : i32 to index
    %c0_7 = arith.constant 0 : index
    %c0_8 = arith.constant 0 : index
    %9 = vector.load %arg5[%8, %c0_7, %c0_8] : memref<4x1x384xf32, #tpu.memory_space<vmem>>, vector<1x1x384xf32>
    %10 = vector.shape_cast %9 : vector<1x1x384xf32> to vector<1x384xf32>
    %cst_9 = arith.constant dense<0.000000e+00> : vector<10x384xf32>
    %11 = tpu.matmul %1, %7, %cst_9 {dimension_numbers = #tpu.dot_dimension_numbers<[1], [0], [0], [1], [0, 0, 1, 1], [], []>} : vector<10x32xf32>, vector<32x384xf32>, vector<10x384xf32> -> vector<10x384xf32>
    %12 = vector.broadcast %10 : vector<1x384xf32> to vector<10x384xf32>
    %13 = arith.addf %11, %12 : vector<10x384xf32>
    %14 = vector.extract_strided_slice %13 {offsets = [0, 0], sizes = [10, 128], strides = [1, 1]} : vector<10x384xf32> to vector<10x128xf32>
    %15 = vector.extract_strided_slice %13 {offsets = [0, 128], sizes = [10, 128], strides = [1, 1]} : vector<10x384xf32> to vector<10x128xf32>
    %16 = vector.extract_strided_slice %13 {offsets = [0, 256], sizes = [10, 128], strides = [1, 1]} : vector<10x384xf32> to vector<10x128xf32>
    %17 = tpu.transpose %15, [1, 0] : vector<10x128xf32> -> vector<128x10xf32>
    %cst_10 = arith.constant dense<0.000000e+00> : vector<10x10xf32>
    %18 = tpu.matmul %14, %17, %cst_10 {dimension_numbers = #tpu.dot_dimension_numbers<[1], [0], [0], [1], [0, 0, 1, 1], [], []>} : vector<10x128xf32>, vector<128x10xf32>, vector<10x10xf32> -> vector<10x10xf32>
    %19 = math.exp %18 : vector<10x10xf32>
    %20 = vector.broadcast %3 : vector<1x10xf32> to vector<10x10xf32>
    %21 = arith.mulf %19, %20 : vector<10x10xf32>
    %cst_11 = arith.constant dense<0.000000e+00> : vector<10xf32>
    %22 = vector.multi_reduction <add>, %21, %cst_11 [1] : vector<10x10xf32> to vector<10xf32>
    %23 = vector.shape_cast %22 : vector<10xf32> to vector<10x1xf32>
    %cst_12 = arith.constant 9.99999993E-9 : f32
    %24 = vector.broadcast %cst_12 : f32 to vector<10x1xf32>
    %25 = arith.addf %23, %24 : vector<10x1xf32>
    %26 = tpu.reciprocal %25 {approx = true} : vector<10x1xf32> -> vector<10x1xf32>
    %cst_13 = arith.constant dense<0.000000e+00> : vector<10x128xf32>
    %27 = tpu.matmul %21, %16, %cst_13 {dimension_numbers = #tpu.dot_dimension_numbers<[1], [0], [0], [1], [0, 0, 1, 1], [], []>} : vector<10x10xf32>, vector<10x128xf32>, vector<10x128xf32> -> vector<10x128xf32>
    %28 = vector.broadcast %26 : vector<10x1xf32> to vector<10x128xf32>
    %29 = arith.mulf %27, %28 : vector<10x128xf32>
    %30 = arith.index_cast %c0_i32 : i32 to index
    %c0_14 = arith.constant 0 : index
    %c0_15 = arith.constant 0 : index
    %31 = vector.load %arg11[%30, %c0_14, %c0_15] : memref<4x10x128xf32, #tpu.memory_space<vmem>>, vector<1x10x128xf32>
    %32 = vector.shape_cast %31 : vector<1x10x128xf32> to vector<10x128xf32>
    %33 = vector.shape_cast %29 : vector<10x128xf32> to vector<1x10x128xf32>
    tpu.vector_store %arg11[%30, %c0_14, %c0_15], %33 {strides = array<i32>} : memref<4x10x128xf32, #tpu.memory_space<vmem>>, vector<1x10x128xf32>,
    %34 = arith.index_cast %c0_i32 : i32 to index
    %c0_16 = arith.constant 0 : index
    %c0_17 = arith.constant 0 : index
    %35 = vector.load %arg6[%34, %c0_16, %c0_17] : memref<4x128x128xf32, #tpu.memory_space<vmem>>, vector<1x128x128xf32>
    %36 = vector.shape_cast %35 : vector<1x128x128xf32> to vector<128x128xf32>
    %cst_18 = arith.constant dense<0.000000e+00> : vector<10x128xf32>
    %37 = tpu.matmul %29, %36, %cst_18 {dimension_numbers = #tpu.dot_dimension_numbers<[1], [0], [0], [1], [0, 0, 1, 1], [], []>} : vector<10x128xf32>, vector<128x128xf32>, vector<10x128xf32> -> vector<10x128xf32>
    %38 = arith.addf %4, %37 : vector<10x128xf32>
    %c1_i32 = arith.constant 1 : i32
    %39 = arith.index_cast %c1_i32 : i32 to index
    %c0_19 = arith.constant 0 : index
    %c0_20 = arith.constant 0 : index
    %40 = vector.load %arg4[%39, %c0_19, %c0_20] : memref<4x32x384xf32, #tpu.memory_space<vmem>>, vector<1x32x384xf32>
    %41 = vector.shape_cast %40 : vector<1x32x384xf32> to vector<32x384xf32>
    %42 = arith.index_cast %c1_i32 : i32 to index
    %c0_21 = arith.constant 0 : index
    %c0_22 = arith.constant 0 : index
    %43 = vector.load %arg5[%42, %c0_21, %c0_22] : memref<4x1x384xf32, #tpu.memory_space<vmem>>, vector<1x1x384xf32>
    %44 = vector.shape_cast %43 : vector<1x1x384xf32> to vector<1x384xf32>
    %cst_23 = arith.constant dense<0.000000e+00> : vector<10x384xf32>
    %45 = tpu.matmul %1, %41, %cst_23 {dimension_numbers = #tpu.dot_dimension_numbers<[1], [0], [0], [1], [0, 0, 1, 1], [], []>} : vector<10x32xf32>, vector<32x384xf32>, vector<10x384xf32> -> vector<10x384xf32>
    %46 = vector.broadcast %44 : vector<1x384xf32> to vector<10x384xf32>
    %47 = arith.addf %45, %46 : vector<10x384xf32>
    %48 = vector.extract_strided_slice %47 {offsets = [0, 0], sizes = [10, 128], strides = [1, 1]} : vector<10x384xf32> to vector<10x128xf32>
    %49 = vector.extract_strided_slice %47 {offsets = [0, 128], sizes = [10, 128], strides = [1, 1]} : vector<10x384xf32> to vector<10x128xf32>
    %50 = vector.extract_strided_slice %47 {offsets = [0, 256], sizes = [10, 128], strides = [1, 1]} : vector<10x384xf32> to vector<10x128xf32>
    %51 = tpu.transpose %49, [1, 0] : vector<10x128xf32> -> vector<128x10xf32>
    %cst_24 = arith.constant dense<0.000000e+00> : vector<10x10xf32>
    %52 = tpu.matmul %48, %51, %cst_24 {dimension_numbers = #tpu.dot_dimension_numbers<[1], [0], [0], [1], [0, 0, 1, 1], [], []>} : vector<10x128xf32>, vector<128x10xf32>, vector<10x10xf32> -> vector<10x10xf32>
    %53 = math.exp %52 : vector<10x10xf32>
    %54 = vector.broadcast %3 : vector<1x10xf32> to vector<10x10xf32>
    %55 = arith.mulf %53, %54 : vector<10x10xf32>
    %cst_25 = arith.constant dense<0.000000e+00> : vector<10xf32>
    %56 = vector.multi_reduction <add>, %55, %cst_25 [1] : vector<10x10xf32> to vector<10xf32>
    %57 = vector.shape_cast %56 : vector<10xf32> to vector<10x1xf32>
    %cst_26 = arith.constant 9.99999993E-9 : f32
    %58 = vector.broadcast %cst_26 : f32 to vector<10x1xf32>
    %59 = arith.addf %57, %58 : vector<10x1xf32>
    %60 = tpu.reciprocal %59 {approx = true} : vector<10x1xf32> -> vector<10x1xf32>
    %cst_27 = arith.constant dense<0.000000e+00> : vector<10x128xf32>
    %61 = tpu.matmul %55, %50, %cst_27 {dimension_numbers = #tpu.dot_dimension_numbers<[1], [0], [0], [1], [0, 0, 1, 1], [], []>} : vector<10x10xf32>, vector<10x128xf32>, vector<10x128xf32> -> vector<10x128xf32>
    %62 = vector.broadcast %60 : vector<10x1xf32> to vector<10x128xf32>
    %63 = arith.mulf %61, %62 : vector<10x128xf32>
    %64 = arith.index_cast %c1_i32 : i32 to index
    %c0_28 = arith.constant 0 : index
    %c0_29 = arith.constant 0 : index
    %65 = vector.load %arg11[%64, %c0_28, %c0_29] : memref<4x10x128xf32, #tpu.memory_space<vmem>>, vector<1x10x128xf32>
    %66 = vector.shape_cast %65 : vector<1x10x128xf32> to vector<10x128xf32>
    %67 = vector.shape_cast %63 : vector<10x128xf32> to vector<1x10x128xf32>
    tpu.vector_store %arg11[%64, %c0_28, %c0_29], %67 {strides = array<i32>} : memref<4x10x128xf32, #tpu.memory_space<vmem>>, vector<1x10x128xf32>,
    %68 = arith.index_cast %c1_i32 : i32 to index
    %c0_30 = arith.constant 0 : index
    %c0_31 = arith.constant 0 : index
    %69 = vector.load %arg6[%68, %c0_30, %c0_31] : memref<4x128x128xf32, #tpu.memory_space<vmem>>, vector<1x128x128xf32>
    %70 = vector.shape_cast %69 : vector<1x128x128xf32> to vector<128x128xf32>
    %cst_32 = arith.constant dense<0.000000e+00> : vector<10x128xf32>
    %71 = tpu.matmul %63, %70, %cst_32 {dimension_numbers = #tpu.dot_dimension_numbers<[1], [0], [0], [1], [0, 0, 1, 1], [], []>} : vector<10x128xf32>, vector<128x128xf32>, vector<10x128xf32> -> vector<10x128xf32>
    %72 = arith.addf %38, %71 : vector<10x128xf32>
    %c2_i32 = arith.constant 2 : i32
    %73 = arith.index_cast %c2_i32 : i32 to index
    %c0_33 = arith.constant 0 : index
    %c0_34 = arith.constant 0 : index
    %74 = vector.load %arg4[%73, %c0_33, %c0_34] : memref<4x32x384xf32, #tpu.memory_space<vmem>>, vector<1x32x384xf32>
    %75 = vector.shape_cast %74 : vector<1x32x384xf32> to vector<32x384xf32>
    %76 = arith.index_cast %c2_i32 : i32 to index
    %c0_35 = arith.constant 0 : index
    %c0_36 = arith.constant 0 : index
    %77 = vector.load %arg5[%76, %c0_35, %c0_36] : memref<4x1x384xf32, #tpu.memory_space<vmem>>, vector<1x1x384xf32>
    %78 = vector.shape_cast %77 : vector<1x1x384xf32> to vector<1x384xf32>
    %cst_37 = arith.constant dense<0.000000e+00> : vector<10x384xf32>
    %79 = tpu.matmul %1, %75, %cst_37 {dimension_numbers = #tpu.dot_dimension_numbers<[1], [0], [0], [1], [0, 0, 1, 1], [], []>} : vector<10x32xf32>, vector<32x384xf32>, vector<10x384xf32> -> vector<10x384xf32>
    %80 = vector.broadcast %78 : vector<1x384xf32> to vector<10x384xf32>
    %81 = arith.addf %79, %80 : vector<10x384xf32>
    %82 = vector.extract_strided_slice %81 {offsets = [0, 0], sizes = [10, 128], strides = [1, 1]} : vector<10x384xf32> to vector<10x128xf32>
    %83 = vector.extract_strided_slice %81 {offsets = [0, 128], sizes = [10, 128], strides = [1, 1]} : vector<10x384xf32> to vector<10x128xf32>
    %84 = vector.extract_strided_slice %81 {offsets = [0, 256], sizes = [10, 128], strides = [1, 1]} : vector<10x384xf32> to vector<10x128xf32>
    %85 = tpu.transpose %83, [1, 0] : vector<10x128xf32> -> vector<128x10xf32>
    %cst_38 = arith.constant dense<0.000000e+00> : vector<10x10xf32>
    %86 = tpu.matmul %82, %85, %cst_38 {dimension_numbers = #tpu.dot_dimension_numbers<[1], [0], [0], [1], [0, 0, 1, 1], [], []>} : vector<10x128xf32>, vector<128x10xf32>, vector<10x10xf32> -> vector<10x10xf32>
    %87 = math.exp %86 : vector<10x10xf32>
    %88 = vector.broadcast %3 : vector<1x10xf32> to vector<10x10xf32>
    %89 = arith.mulf %87, %88 : vector<10x10xf32>
    %cst_39 = arith.constant dense<0.000000e+00> : vector<10xf32>
    %90 = vector.multi_reduction <add>, %89, %cst_39 [1] : vector<10x10xf32> to vector<10xf32>
    %91 = vector.shape_cast %90 : vector<10xf32> to vector<10x1xf32>
    %cst_40 = arith.constant 9.99999993E-9 : f32
    %92 = vector.broadcast %cst_40 : f32 to vector<10x1xf32>
    %93 = arith.addf %91, %92 : vector<10x1xf32>
    %94 = tpu.reciprocal %93 {approx = true} : vector<10x1xf32> -> vector<10x1xf32>
    %cst_41 = arith.constant dense<0.000000e+00> : vector<10x128xf32>
    %95 = tpu.matmul %89, %84, %cst_41 {dimension_numbers = #tpu.dot_dimension_numbers<[1], [0], [0], [1], [0, 0, 1, 1], [], []>} : vector<10x10xf32>, vector<10x128xf32>, vector<10x128xf32> -> vector<10x128xf32>
    %96 = vector.broadcast %94 : vector<10x1xf32> to vector<10x128xf32>
    %97 = arith.mulf %95, %96 : vector<10x128xf32>
    %98 = arith.index_cast %c2_i32 : i32 to index
    %c0_42 = arith.constant 0 : index
    %c0_43 = arith.constant 0 : index
    %99 = vector.load %arg11[%98, %c0_42, %c0_43] : memref<4x10x128xf32, #tpu.memory_space<vmem>>, vector<1x10x128xf32>
    %100 = vector.shape_cast %99 : vector<1x10x128xf32> to vector<10x128xf32>
    %101 = vector.shape_cast %97 : vector<10x128xf32> to vector<1x10x128xf32>
    tpu.vector_store %arg11[%98, %c0_42, %c0_43], %101 {strides = array<i32>} : memref<4x10x128xf32, #tpu.memory_space<vmem>>, vector<1x10x128xf32>,
    %102 = arith.index_cast %c2_i32 : i32 to index
    %c0_44 = arith.constant 0 : index
    %c0_45 = arith.constant 0 : index
    %103 = vector.load %arg6[%102, %c0_44, %c0_45] : memref<4x128x128xf32, #tpu.memory_space<vmem>>, vector<1x128x128xf32>
    %104 = vector.shape_cast %103 : vector<1x128x128xf32> to vector<128x128xf32>
    %cst_46 = arith.constant dense<0.000000e+00> : vector<10x128xf32>
    %105 = tpu.matmul %97, %104, %cst_46 {dimension_numbers = #tpu.dot_dimension_numbers<[1], [0], [0], [1], [0, 0, 1, 1], [], []>} : vector<10x128xf32>, vector<128x128xf32>, vector<10x128xf32> -> vector<10x128xf32>
    %106 = arith.addf %72, %105 : vector<10x128xf32>
    %c3_i32 = arith.constant 3 : i32
    %107 = arith.index_cast %c3_i32 : i32 to index
    %c0_47 = arith.constant 0 : index
    %c0_48 = arith.constant 0 : index
    %108 = vector.load %arg4[%107, %c0_47, %c0_48] : memref<4x32x384xf32, #tpu.memory_space<vmem>>, vector<1x32x384xf32>
    %109 = vector.shape_cast %108 : vector<1x32x384xf32> to vector<32x384xf32>
    %110 = arith.index_cast %c3_i32 : i32 to index
    %c0_49 = arith.constant 0 : index
    %c0_50 = arith.constant 0 : index
    %111 = vector.load %arg5[%110, %c0_49, %c0_50] : memref<4x1x384xf32, #tpu.memory_space<vmem>>, vector<1x1x384xf32>
    %112 = vector.shape_cast %111 : vector<1x1x384xf32> to vector<1x384xf32>
    %cst_51 = arith.constant dense<0.000000e+00> : vector<10x384xf32>
    %113 = tpu.matmul %1, %109, %cst_51 {dimension_numbers = #tpu.dot_dimension_numbers<[1], [0], [0], [1], [0, 0, 1, 1], [], []>} : vector<10x32xf32>, vector<32x384xf32>, vector<10x384xf32> -> vector<10x384xf32>
    %114 = vector.broadcast %112 : vector<1x384xf32> to vector<10x384xf32>
    %115 = arith.addf %113, %114 : vector<10x384xf32>
    %116 = vector.extract_strided_slice %115 {offsets = [0, 0], sizes = [10, 128], strides = [1, 1]} : vector<10x384xf32> to vector<10x128xf32>
    %117 = vector.extract_strided_slice %115 {offsets = [0, 128], sizes = [10, 128], strides = [1, 1]} : vector<10x384xf32> to vector<10x128xf32>
    %118 = vector.extract_strided_slice %115 {offsets = [0, 256], sizes = [10, 128], strides = [1, 1]} : vector<10x384xf32> to vector<10x128xf32>
    %119 = tpu.transpose %117, [1, 0] : vector<10x128xf32> -> vector<128x10xf32>
    %cst_52 = arith.constant dense<0.000000e+00> : vector<10x10xf32>
    %120 = tpu.matmul %116, %119, %cst_52 {dimension_numbers = #tpu.dot_dimension_numbers<[1], [0], [0], [1], [0, 0, 1, 1], [], []>} : vector<10x128xf32>, vector<128x10xf32>, vector<10x10xf32> -> vector<10x10xf32>
    %121 = math.exp %120 : vector<10x10xf32>
    %122 = vector.broadcast %3 : vector<1x10xf32> to vector<10x10xf32>
    %123 = arith.mulf %121, %122 : vector<10x10xf32>
    %cst_53 = arith.constant dense<0.000000e+00> : vector<10xf32>
    %124 = vector.multi_reduction <add>, %123, %cst_53 [1] : vector<10x10xf32> to vector<10xf32>
    %125 = vector.shape_cast %124 : vector<10xf32> to vector<10x1xf32>
    %cst_54 = arith.constant 9.99999993E-9 : f32
    %126 = vector.broadcast %cst_54 : f32 to vector<10x1xf32>
    %127 = arith.addf %125, %126 : vector<10x1xf32>
    %128 = tpu.reciprocal %127 {approx = true} : vector<10x1xf32> -> vector<10x1xf32>
    %cst_55 = arith.constant dense<0.000000e+00> : vector<10x128xf32>
    %129 = tpu.matmul %123, %118, %cst_55 {dimension_numbers = #tpu.dot_dimension_numbers<[1], [0], [0], [1], [0, 0, 1, 1], [], []>} : vector<10x10xf32>, vector<10x128xf32>, vector<10x128xf32> -> vector<10x128xf32>
    %130 = vector.broadcast %128 : vector<10x1xf32> to vector<10x128xf32>
    %131 = arith.mulf %129, %130 : vector<10x128xf32>
    %132 = arith.index_cast %c3_i32 : i32 to index
    %c0_56 = arith.constant 0 : index
    %c0_57 = arith.constant 0 : index
    %133 = vector.load %arg11[%132, %c0_56, %c0_57] : memref<4x10x128xf32, #tpu.memory_space<vmem>>, vector<1x10x128xf32>
    %134 = vector.shape_cast %133 : vector<1x10x128xf32> to vector<10x128xf32>
    %135 = vector.shape_cast %131 : vector<10x128xf32> to vector<1x10x128xf32>
    tpu.vector_store %arg11[%132, %c0_56, %c0_57], %135 {strides = array<i32>} : memref<4x10x128xf32, #tpu.memory_space<vmem>>, vector<1x10x128xf32>,
    %136 = arith.index_cast %c3_i32 : i32 to index
    %c0_58 = arith.constant 0 : index
    %c0_59 = arith.constant 0 : index
    %137 = vector.load %arg6[%136, %c0_58, %c0_59] : memref<4x128x128xf32, #tpu.memory_space<vmem>>, vector<1x128x128xf32>
    %138 = vector.shape_cast %137 : vector<1x128x128xf32> to vector<128x128xf32>
    %cst_60 = arith.constant dense<0.000000e+00> : vector<10x128xf32>
    %139 = tpu.matmul %131, %138, %cst_60 {dimension_numbers = #tpu.dot_dimension_numbers<[1], [0], [0], [1], [0, 0, 1, 1], [], []>} : vector<10x128xf32>, vector<128x128xf32>, vector<10x128xf32> -> vector<10x128xf32>
    %140 = arith.addf %106, %139 : vector<10x128xf32>
    %c4_i32 = arith.constant 4 : i32
    %c0_61 = arith.constant 0 : index
    %c0_62 = arith.constant 0 : index
    %141 = vector.load %arg7[%c0_61, %c0_62] : memref<1x128xf32, #tpu.memory_space<vmem>>, vector<1x128xf32>
    %142 = vector.broadcast %141 : vector<1x128xf32> to vector<10x128xf32>
    %143 = arith.addf %140, %142 : vector<10x128xf32>
    %144 = math.tanh %143 : vector<10x128xf32>
    %c0_63 = arith.constant 0 : index
    %c0_64 = arith.constant 0 : index
    %145 = vector.load %arg8[%c0_63, %c0_64] : memref<1x128xf32, #tpu.memory_space<vmem>>, vector<1x128xf32>
    %146 = vector.broadcast %145 : vector<1x128xf32> to vector<10x128xf32>
    %147 = arith.mulf %144, %146 : vector<10x128xf32>
    %cst_65 = arith.constant dense<0.000000e+00> : vector<10xf32>
    %148 = vector.multi_reduction <add>, %147, %cst_65 [1] : vector<10x128xf32> to vector<10xf32>
    %149 = vector.shape_cast %148 : vector<10xf32> to vector<10x1xf32>
    %c0_66 = arith.constant 0 : index
    %c0_67 = arith.constant 0 : index
    %150 = vector.load %arg9[%c0_66, %c0_67] : memref<1x1xf32, #tpu.memory_space<vmem>>, vector<1x1xf32>
    %151 = vector.broadcast %150 : vector<1x1xf32> to vector<10x1xf32>
    %152 = arith.addf %149, %151 : vector<10x1xf32>
    %153 = math.exp %152 : vector<10x1xf32>
    %c0_68 = arith.constant 0 : index
    %c0_69 = arith.constant 0 : index
    %c0_70 = arith.constant 0 : index
    %154 = vector.load %arg3[%c0_68, %c0_69, %c0_70] : memref<1x10x1xf32, #tpu.memory_space<vmem>>, vector<1x10x1xf32>
    %155 = vector.shape_cast %154 : vector<1x10x1xf32> to vector<10x1xf32>
    %156 = arith.mulf %153, %155 : vector<10x1xf32>
    %cst_71 = arith.constant dense<0.000000e+00> : vector<1xf32>
    %157 = vector.multi_reduction <add>, %156, %cst_71 [0] : vector<10x1xf32> to vector<1xf32>
    %158 = vector.shape_cast %157 : vector<1xf32> to vector<1x1xf32>
    %cst_72 = arith.constant 9.99999993E-9 : f32
    %159 = vector.broadcast %cst_72 : f32 to vector<1x1xf32>
    %160 = arith.addf %158, %159 : vector<1x1xf32>
    %161 = tpu.reciprocal %160 {approx = true} : vector<1x1xf32> -> vector<1x1xf32>
    %c0_73 = arith.constant 0 : index
    %c0_74 = arith.constant 0 : index
    %c0_75 = arith.constant 0 : index
    %162 = vector.load %arg11[%c0_73, %c0_74, %c0_75] : memref<4x10x128xf32, #tpu.memory_space<vmem>>, vector<1x10x128xf32>
    %163 = vector.shape_cast %162 : vector<1x10x128xf32> to vector<10x128xf32>
    %164 = vector.broadcast %156 : vector<10x1xf32> to vector<10x128xf32>
    %165 = arith.mulf %163, %164 : vector<10x128xf32>
    %cst_76 = arith.constant dense<0.000000e+00> : vector<128xf32>
    %166 = vector.multi_reduction <add>, %165, %cst_76 [0] : vector<10x128xf32> to vector<128xf32>
    %167 = vector.shape_cast %166 : vector<128xf32> to vector<1x128xf32>
    %c1 = arith.constant 1 : index
    %c0_77 = arith.constant 0 : index
    %c0_78 = arith.constant 0 : index
    %168 = vector.load %arg11[%c1, %c0_77, %c0_78] : memref<4x10x128xf32, #tpu.memory_space<vmem>>, vector<1x10x128xf32>
    %169 = vector.shape_cast %168 : vector<1x10x128xf32> to vector<10x128xf32>
    %170 = vector.broadcast %156 : vector<10x1xf32> to vector<10x128xf32>
    %171 = arith.mulf %169, %170 : vector<10x128xf32>
    %cst_79 = arith.constant dense<0.000000e+00> : vector<128xf32>
    %172 = vector.multi_reduction <add>, %171, %cst_79 [0] : vector<10x128xf32> to vector<128xf32>
    %173 = vector.shape_cast %172 : vector<128xf32> to vector<1x128xf32>
    %c2 = arith.constant 2 : index
    %c0_80 = arith.constant 0 : index
    %c0_81 = arith.constant 0 : index
    %174 = vector.load %arg11[%c2, %c0_80, %c0_81] : memref<4x10x128xf32, #tpu.memory_space<vmem>>, vector<1x10x128xf32>
    %175 = vector.shape_cast %174 : vector<1x10x128xf32> to vector<10x128xf32>
    %176 = vector.broadcast %156 : vector<10x1xf32> to vector<10x128xf32>
    %177 = arith.mulf %175, %176 : vector<10x128xf32>
    %cst_82 = arith.constant dense<0.000000e+00> : vector<128xf32>
    %178 = vector.multi_reduction <add>, %177, %cst_82 [0] : vector<10x128xf32> to vector<128xf32>
    %179 = vector.shape_cast %178 : vector<128xf32> to vector<1x128xf32>
    %c3 = arith.constant 3 : index
    %c0_83 = arith.constant 0 : index
    %c0_84 = arith.constant 0 : index
    %180 = vector.load %arg11[%c3, %c0_83, %c0_84] : memref<4x10x128xf32, #tpu.memory_space<vmem>>, vector<1x10x128xf32>
    %181 = vector.shape_cast %180 : vector<1x10x128xf32> to vector<10x128xf32>
    %182 = vector.broadcast %156 : vector<10x1xf32> to vector<10x128xf32>
    %183 = arith.mulf %181, %182 : vector<10x128xf32>
    %cst_85 = arith.constant dense<0.000000e+00> : vector<128xf32>
    %184 = vector.multi_reduction <add>, %183, %cst_85 [0] : vector<10x128xf32> to vector<128xf32>
    %185 = vector.shape_cast %184 : vector<128xf32> to vector<1x128xf32>
    %186 = tpu.concatenate %167, %173, %179, %185 in 0 : vector<1x128xf32>, vector<1x128xf32>, vector<1x128xf32>, vector<1x128xf32> -> vector<4x128xf32>
    %187 = vector.broadcast %161 : vector<1x1xf32> to vector<4x128xf32>
    %188 = arith.mulf %186, %187 : vector<4x128xf32>
    %c0_86 = arith.constant 0 : index
    %c0_87 = arith.constant 0 : index
    %c0_88 = arith.constant 0 : index
    %189 = vector.load %arg10[%c0_86, %c0_87, %c0_88] : memref<1x4x128xf32, #tpu.memory_space<vmem>>, vector<1x4x128xf32>
    %190 = vector.shape_cast %189 : vector<1x4x128xf32> to vector<4x128xf32>
    %191 = vector.shape_cast %188 : vector<4x128xf32> to vector<1x4x128xf32>
    tpu.vector_store %arg10[%c0_86, %c0_87, %c0_88], %191 {strides = array<i32>} : memref<1x4x128xf32, #tpu.memory_space<vmem>>, vector<1x4x128xf32>,
    return
  }
  func.func @transform_0(%arg0: i32) -> (i32, i32, i32) {
    %c0_i32 = arith.constant 0 : i32
    %c0_i32_0 = arith.constant 0 : i32
    %c0_i32_1 = arith.constant 0 : i32
    return %arg0, %c0_i32, %c0_i32_0 : i32, i32, i32
  }
  func.func @transform_1(%arg0: i32) -> (i32, i32, i32) {
    %c0_i32 = arith.constant 0 : i32
    %c0_i32_0 = arith.constant 0 : i32
    %c0_i32_1 = arith.constant 0 : i32
    return %arg0, %c0_i32, %c0_i32_0 : i32, i32, i32
  }
  func.func @transform_2(%arg0: i32) -> (i32, i32, i32) {
    %c0_i32 = arith.constant 0 : i32
    %c0_i32_0 = arith.constant 0 : i32
    %c0_i32_1 = arith.constant 0 : i32
    return %arg0, %c0_i32, %c0_i32_0 : i32, i32, i32
  }
  func.func @transform_3(%arg0: i32) -> (i32, i32, i32) {
    %c0_i32 = arith.constant 0 : i32
    %c0_i32_0 = arith.constant 0 : i32
    %c0_i32_1 = arith.constant 0 : i32
    %c0_i32_2 = arith.constant 0 : i32
    return %c0_i32, %c0_i32_0, %c0_i32_1 : i32, i32, i32
  }
  func.func @transform_4(%arg0: i32) -> (i32, i32, i32) {
    %c0_i32 = arith.constant 0 : i32
    %c0_i32_0 = arith.constant 0 : i32
    %c0_i32_1 = arith.constant 0 : i32
    %c0_i32_2 = arith.constant 0 : i32
    return %c0_i32, %c0_i32_0, %c0_i32_1 : i32, i32, i32
  }
  func.func @transform_5(%arg0: i32) -> (i32, i32, i32) {
    %c0_i32 = arith.constant 0 : i32
    %c0_i32_0 = arith.constant 0 : i32
    %c0_i32_1 = arith.constant 0 : i32
    %c0_i32_2 = arith.constant 0 : i32
    return %c0_i32, %c0_i32_0, %c0_i32_1 : i32, i32, i32
  }
  func.func @transform_6(%arg0: i32) -> (i32, i32) {
    %c0_i32 = arith.constant 0 : i32
    %c0_i32_0 = arith.constant 0 : i32
    %c0_i32_1 = arith.constant 0 : i32
    return %c0_i32, %c0_i32_0 : i32, i32
  }
  func.func @transform_7(%arg0: i32) -> (i32, i32) {
    %c0_i32 = arith.constant 0 : i32
    %c0_i32_0 = arith.constant 0 : i32
    %c0_i32_1 = arith.constant 0 : i32
    return %c0_i32, %c0_i32_0 : i32, i32
  }
  func.func @transform_8(%arg0: i32) -> (i32, i32) {
    %c0_i32 = arith.constant 0 : i32
    %c0_i32_0 = arith.constant 0 : i32
    %c0_i32_1 = arith.constant 0 : i32
    return %c0_i32, %c0_i32_0 : i32, i32
  }
  func.func @transform_9(%arg0: i32) -> (i32, i32, i32) {
    %c0_i32 = arith.constant 0 : i32
    %c0_i32_0 = arith.constant 0 : i32
    %c0_i32_1 = arith.constant 0 : i32
    return %arg0, %c0_i32, %c0_i32_0 : i32, i32, i32
  }
}

</mosaic_0001>

<bundles_post_ra>
// kernel: tpu_custom_call.1
= control target key start
LH: loop header
LB: loop body
LE: loop exit
PB: predicated region body
PF: predicated region fallthrough
CT: control target
= control target key end

     0   :  { %s2105_s0 = inlined_call_operand.vmem [shape: f32[2,10,32], index: 0, kind: input, shape index: {}]   ;;  %s2106_s1 = inlined_call_operand.vmem [shape: f32[2,1,10], index: 1, kind: input, shape index: {}]   ;;  %s2107_s2 = inlined_call_operand.vmem [shape: f32[2,10,1], index: 2, kind: input, shape index: {}]   ;;  %s2108_s3 = inlined_call_operand.hbm [shape: f32[4,32,384], index: 3, kind: input, shape index: {}]   ;;  %s2109_s4 = inlined_call_operand.vmem [shape: f32[4,1,384], index: 4, kind: input, shape index: {}]   ;;  %s2110_s5 = inlined_call_operand.hbm [shape: f32[4,128,128], index: 5, kind: input, shape index: {}]   ;;  %s2111_s6 = inlined_call_operand.vmem [shape: f32[1,128], index: 6, kind: input, shape index: {}]   ;;  %s2112_s7 = inlined_call_operand.vmem [shape: f32[1,128], index: 7, kind: input, shape index: {}]   ;;  %s2113_s8 = inlined_call_operand.<no memory space> [shape: f32[1,1], index: 8, kind: input, shape index: {}]   ;;  %s2114_s9 = inlined_call_operand.hbm [shape: f32[2,4,128], index: 9, kind: output, shape index: {}]  }
   0x1   :  { %v14_v0 = vstv %s2113_s8 }
   0x2   :  { %15 = vst [vmem:[#allocation3] sm:$0x1] %v14_v0 }
   0x3   :  { %16 = vsyncpa [#allocation5], 0 }
   0x4   :  { %17 = vsyncpa [#allocation8], 0 }
   0x5   :  { %18 = vsyncpa [#allocation6], 0 }
   0x6   :  { %20 = vsyncpa [#allocation6 + $0x1], 0  ;;  %s1843_s11 = smov 0   ;;  %s1845_s12 = smov 0  }
   0x7   :  { %s1847_s13 = smov 0   ;;  %s1849_s14 = smov 0  }
   0x8 LB: > { %s1864_s8 = sadd.s32 4294967295, %s1781_s14   ;;  %s1479_s15 = sadd.s32 4294967294, %s1781_s14   ;;  %s1781_s14 = sphi %s1849_s14, %s2121_s14   ;;  %s1777_s13 = sphi %s1847_s13, %s2120_s13   ;;  %s1773_s12 = sphi %s1845_s12, %s2119_s12   ;;  %s1769_s11 = sphi %s1843_s11, %s2118_s11  }
   0x9   : > { %s1868_s16 = sadd.s32 1, %s1781_s14   ;;  %s237_s17 = sadd.s32 1, %s1777_s13 }
   0xa   : > { %s234_s18 = ssub.s32 %s1781_s14, %s1868_s16  ;;  %p247_p0 = scmp.ne.s32.totalorder %s1777_s13, %s1773_s12 }
   0xb   : > { %p235_p1 = scmp.eq.s32.totalorder %s234_s18, 0  ;;  %p248_p2 = scmp.eq.s32.totalorder %s1864_s8, 1 }
   0xc   : > { %p253_p3 = scmp.ne.s32.totalorder %s1773_s12, %s1769_s11  ;;  %p254_p4 = scmp.eq.s32.totalorder %s1479_s15, 1 }
   0xd   : > { %s1879_s19 = scalar_select %p235_p1, %s1777_s13, %s237_s17  }
   0xe   : > { %p1881_p5 = por %p248_p2, %p247_p0  ;;  %p1885_p6 = por %p254_p4, %p253_p3 }
   0xf   : > { %p1480_p7 = scmp.ge.s32.totalorder %s1781_s14, 1  ;;  %p261_p8 = scmp.lt.s32.totalorder %s1781_s14, 3 }
  0x10   : > { %p1558_p9 = scmp.eq.s32.totalorder %s1864_s8, 0  ;;  %s272_s25 = sshll.u32 %s2108_s3, 4  ;;  %s273_s25 = int_to_ptr.hbm [resolvable:$true] %s272_s25 }
  0x11   : > { %p1892_p10 = pnand %p1480_p7, %p261_p8  ;;  %s1783_s26 = smov [#allocation4]  }
  0x12   : > { %s274_s27 = sshll.u32 %s1783_s26, 4  ;;  %s289_s30 = sshll.u32 %s2110_s5, 4  ;;  %s275_s27 = int_to_ptr.vmem [resolvable:$true] %s274_s27  ;;  %s290_s30 = int_to_ptr.hbm [resolvable:$true] %s289_s30 }
  0x13   : > { %p1547_p11 = pneg %p1892_p10  ;;  %s1784_s10 = smov 384  }
  0x14   : > { %s1785_s15 = smov 24   ;;  %s1786_s17 = smov [#allocation7]  }
  0x15   : > { %p1548_p12 = pnand %p1558_p9, %p1547_p11  ;;  %s291_s18 = sshll.u32 %s1786_s17, 4  ;;  %s292_s18 = int_to_ptr.vmem [resolvable:$true] %s291_s18 }
  0x16   : > { %s1787_s23 = smov 128   ;;  %s1788_s24 = smov 8  }
  0x17   : > { %1550 = dma.hbm_to_vmem [thread:$0]  (!%p1548_p12), %s273_s25, 6144, %s275_s27, [#allocation5], %s1784_s10, %s1784_s10, %s1785_s15  }
  0x18   : > { %1553 = dma.hbm_to_vmem [thread:$0]  (!%p1548_p12), %s290_s30, 8192, %s292_s18, [#allocation8], %s1787_s23, %s1787_s23, %s1788_s24  }
  0x19   : > { %338 = sbr.rel (%p1892_p10) target bundleno = 1492 (0x5d4), region = 56 }
  0x1e   : > { %1756 = dma.done.wait (%p1558_p9), [#allocation5], 6144  }
  0x1f   : > { %1758 = vsyncadd (%p1558_p9), [#allocation5], 4294961152 }
  0x20   : > { %1760 = dma.done.wait (%p1558_p9), [#allocation8], 8192  }
  0x21   : > { %1762 = vsyncadd (%p1558_p9), [#allocation8], 4294959104  ;;  %p388_p13 = scmp.lt.s32.totalorder %s1864_s8, 1  ;;  %v414_v1 = vld [vmem:[#allocation4 + $0x50] sm:$0xff]  ;;  %v411_v2 = vld [vmem:[#allocation4 + $0x38] sm:$0xff]  ;;  %vm424_vm0 = vcmask 261120  }
  0x22   : > { %466 = vmatpush.msra.mxu1 %v414_v1  ;;  %v413_v3 = vld [vmem:[#allocation4 + $0x48] sm:$0xff]  ;;  %v408_v4 = vld [vmem:[#allocation4 + $0x20] sm:$0xff]  ;;  %v410_v5 = vld [vmem:[#allocation4 + $0x30] sm:$0xff]  ;;  %vm550_vm1 = vcmask 1041408   ;;  %vm532_vm2 = vcmask 80896   ;;  %vm536_vm3 = vcmask 74752  }
  0x23   : > { %s1918_s25 = scalar_select %p388_p13, %s1864_s8, 1  ;;  %443 = vmatpush.msra.mxu0 %v413_v3  ;;  %v407_v6 = vld [vmem:[#allocation4 + $0x18] sm:$0xff]  ;;  %v412_v8 = vld [vmem:[#allocation4 + $0x40] sm:$0xff]  ;;  %v405_v9 = vld [vmem:[#allocation4 + $0x8] sm:$0xff]  ;;  %vm1278_vm4 = vcmask 7168   ;;  %vm1280_vm5 = vcmask 1024  }
  0x24   : > { %467 = vmatpush.msra.mxu1 %v411_v2  ;;  %v415_v7 = vld [vmem:[#allocation4 + $0x58] sm:$0xff]  ;;  %v404_v11 = vld [vmem:[#allocation4] sm:$0xff]  ;;  %v409_v12 = vld [vmem:[#allocation4 + $0x28] sm:$0xff]  ;;  %vm1349_vm6 = vcmask 1040384   ;;  %s1532_s24 = sshll.u32 %s1864_s8, 2  ;;  %vm1352_vm7 = vcmask 1042432  }
  0x25   : > { %s1535_s22 = sshll.u32 %s1918_s25, 4  ;;  %444 = vmatpush.msra.mxu0 %v410_v5  ;;  %489 = vmatpush.msra.mxu3 %v415_v7  ;;  %v406_v13 = vld [vmem:[#allocation4 + $0x10] sm:$0xff]  ;;  %v605_v16 = vld [vmem:[#allocation4 + $0x98] sm:$0xff]  ;;  %v602_v17 = vld [vmem:[#allocation4 + $0x80] sm:$0xff]  ;;  %s395_s17 = scalar_lea.vmem %s2106_s1, %s1918_s25 }
  0x26   : > { %s392_s28 = scalar_lea.vmem %s2105_s0, %s1535_s22  ;;  %468 = vmatpush.msra.mxu1 %v408_v4  ;;  %v608_v15 = vld [vmem:[#allocation4 + $0xb0] sm:$0xff]  ;;  %v599_v18 = vld [vmem:[#allocation4 + $0x68] sm:$0xff]  ;;  %v601_v21 = vld [vmem:[#allocation4 + $0x78] sm:$0xff]  ;;  %s400_s23 = scalar_lea.vmem %s2107_s2, %s1535_s22 }
  0x27   : > { %v1926_v10 = vld [vmem:[%s392_s28] sm:$0xff]  ;;  %445 = vmatpush.msra.mxu0 %v407_v6  ;;  %490 = vmatpush.msra.mxu3 %v412_v8  ;;  %v1934_v14 = vld [vmem:[%s392_s28 + $0x8] sm:$0x3]  ;;  %v604_v20 = vld [vmem:[#allocation4 + $0x90] sm:$0xff]  ;;  %s385_s25 = sand.u32 1, %s1773_s12   ;;  %s1372_s28 = scalar_lea.hbm %s2114_s9, %s1532_s24 }
  0x28   : > { %469 = vmatpush.msra.mxu1 %v405_v9  ;;  %654 = vmatpush.msra.mxu2 %v608_v15  ;;  %v607_v19 = vld [vmem:[#allocation4 + $0xa8] sm:$0xff]  ;;  %v598_v22 = vld [vmem:[#allocation4 + $0x60] sm:$0xff]  ;;  %v609_v41 = vld [vmem:[#allocation4 + $0xb8] sm:$0xff]  ;;  %s1487_s22 = sshll.u32 %s385_s25, 2  ;;  %s1376_s10 = sshll.u32 %s1372_s28, 4  ;;  %s1377_s10 = int_to_ptr.hbm [resolvable:$true] %s1376_s10 }
  0x29   : > { %1494 = vmatmul.msk.f32.vlgmr.msra.gmra.mxu1 %vm424_vm0, %v1926_v10  ;;  %446 = vmatpush.msra.mxu0 %v404_v11  ;;  %v416_v24 = vld [vmem:[%s2109_s4] sm:$0x7]  ;;  %v1961_v40 = vld [vmem:[%s2109_s4 + $0x3] sm:$0x7]  ;;  %v603_v44 = vld [vmem:[#allocation4 + $0x88] sm:$0xff]  ;;  %s387_s29 = scalar_lea.vmem [#allocation9], %s1487_s22 }
  0x2a   : > { %1492 = vmatmul.msk.f32.vlgmr.msra.gmra.mxu0 %vm424_vm0, %v1926_v10  ;;  %491 = vmatpush.msra.mxu3 %v409_v12  ;;  %v419_v25 = vperm.slane %v416_v24, 1  ;;  %v418_v29 = vperm.slane %v416_v24, 0  ;;  %v420_v33 = vperm.slane %v416_v24, 2  ;;  %v614_v42 = vperm.slane %v1961_v40, 1  ;;  %v606_v43 = vld [vmem:[#allocation4 + $0xa0] sm:$0xff]  ;;  %v600_v47 = vld [vmem:[#allocation4 + $0x70] sm:$0xff] }
  0x2b   : > { %655 = vmatpush.msra.mxu2 %v605_v16  ;;  %631 = vmatpush.msrb.mxu1 %v607_v19  ;;  %v596_v51 = vld [vmem:[#allocation7 + $0x78] sm:$0xff]  ;;  %v595_v52 = vld [vmem:[#allocation7 + $0x70] sm:$0xff]  ;;  %v594_v54 = vld [vmem:[#allocation7 + $0x68] sm:$0xff]  ;;  %v613_v6 = vperm.slane %v1961_v40, 0  ;;  %s1374_s30 = sshll.u32 %s387_s29, 4  ;;  %s1362_s8 = scalar_lea.sflag [#allocation6], %s385_s25  ;;  %s1375_s30 = int_to_ptr.vmem [resolvable:$true] %s1374_s30 }
  0x2c   : > { %492 = vmatpush.msra.mxu3 %v406_v13  ;;  %v1968_v53 = vld [vmem:[%s395_s17] ss:$0 sm:$0xff]  ;;  %v593_v56 = vld [vmem:[#allocation7 + $0x60] sm:$0xff]  ;;  %v591_v62 = vld [vmem:[#allocation7 + $0x50] sm:$0xff]  ;;  %s1725_s15 = sshra.s32 %s1377_s10, 4  ;;  %s1731_s22 = scalar_lea.hbm %s2114_s9, 8  ;;  %s1726_s15 = int_to_ptr.hbm [resolvable:$true] %s1725_s15 }
  0x2d   : > { %1496 = vmatmul.msk.f32.vlgmr.msra.gmra.mxu3 %vm424_vm0, %v1926_v10  ;;  %656 = vmatpush.msra.mxu2 %v602_v17  ;;  %v592_v60 = vld [vmem:[#allocation7 + $0x58] sm:$0xff]  ;;  %v590_v63 = vld [vmem:[#allocation7 + $0x48] sm:$0xff]  ;;  %v589_v0 = vld [vmem:[#allocation7 + $0x40] sm:$0xff]  ;;  %s1727_s17 = scalar_lea.hbm %s1726_s15, 4  ;;  %p1732_p3 = scmp.lt.s32.totalorder %s1726_s15, %s2114_s9 }
  0x2e   : > { %632 = vmatpush.msrb.mxu1 %v604_v20  ;;  %v588_v3 = vld [vmem:[#allocation7 + $0x38] sm:$0xff]  ;;  %v587_v7 = vld [vmem:[#allocation7 + $0x30] sm:$0xff]  ;;  %v586_v12 = vld [vmem:[#allocation7 + $0x28] sm:$0xff]  ;;  %v615_v20 = vperm.slane %v1961_v40, 2  ;;  %p1728_p0 = scmp.ne.s32.totalorder %s1726_s15, %s1727_s17  ;;  %p1733_p4 = scmp.lt.s32.totalorder %s1731_s22, %s1727_s17 }
  0x2f   : > { %657 = vmatpush.msra.mxu2 %v599_v18  ;;  %v585_v13 = vld [vmem:[#allocation7 + $0x20] sm:$0xff]  ;;  %v584_v15 = vld [vmem:[#allocation7 + $0x18] sm:$0xff]  ;;  %v583_v16 = vld [vmem:[#allocation7 + $0x10] sm:$0xff] }
  0x30   : > { %1504 = vmatmul.msk.f32.vlgmr.msra.gmra.mxu2 %vm424_vm0, %v1926_v10  ;;  %633 = vmatpush.msrb.mxu1 %v601_v21  ;;  %v582_v17 = vld [vmem:[#allocation7 + $0x8] sm:$0xff]  ;;  %v581_v18 = vld [vmem:[#allocation7] sm:$0xff]  ;;  %p1729_p1 = pnand %p1728_p0, %p1881_p5  ;;  %p1734_p7 = por %p1733_p4, %p1732_p3 }
  0x31   : > { %1495 = vmatmul.msk.f32.gmra.mxu1 %vm424_vm0, %v1934_v14 }
  0x32   : > { %1493 = vmatmul.msk.f32.gmra.mxu0 %vm424_vm0, %v1934_v14  ;;  %634 = vmatpush.msrb.mxu1 %v598_v22  ;;  %p1730_p2 = pneg %p1729_p1 }
  0x34   : > { %p1735_p8 = pnand %p1734_p7, %p1730_p2 }
  0x35   : > { %1497 = vmatmul.msk.f32.gmra.mxu3 %vm424_vm0, %v1934_v14 }
  0x38   : > { %1505 = vmatmul.msk.f32.gmra.mxu2 %vm424_vm0, %v1934_v14 }
  0x39   : > { %1502 = vmatmul.msk.f32.vlgmr.msrb.gmra.mxu1 %vm424_vm0, %v1926_v10 }
  0x41   : > { %1503 = vmatmul.msk.f32.gmra.mxu1 %vm424_vm0, %v1934_v14 }
  0xa6   : > { %v471_v23 = vpop.f32.mrf.mxu1 }
  0xa7   : > { %v448_v28 = vpop.f32.mrf.mxu0  ;;  %v472_v31 = vadd.f32 %v471_v23, %v419_v25 }
  0xa8   : > { %v449_v32 = vadd.f32 %v448_v28, %v418_v29 }
  0xae   : > { %v474_v26 = vpop.f32.mrf.mxu1 }
  0xaf   : > { %v475_v27 = vadd.f32 %v474_v26, %v419_v25  ;;  %v451_v35 = vpop.f32.mrf.mxu0 }
  0xb0   : > { %v494_v30 = vpop.f32.mrf.mxu3  ;;  %v452_v38 = vadd.f32 %v451_v35, %v418_v29 }
  0xb1   : > { %514 = vmatpush.xpose.msrb.mxu3 %v475_v27  ;;  %v495_v36 = vadd.f32 %v494_v30, %v420_v33 }
  0xb3   : > { %v659_v39 = vpop.f32.mrf.mxu2 }
  0xb4   : > { %v660_v48 = vadd.f32 %v659_v39, %v614_v42 }
  0xb5   : > { %515 = vmatpush.xpose.msrb.mxu3 %v472_v31  ;;  %v838_v31 = vld [vmem:[#allocation4 + $0x110] sm:$0xff] }
  0xb6   : > { %v636_v4 = vpop.f32.mrf.mxu1 }
  0xb7   : > { %v637_v8 = vadd.f32 %v636_v4, %v613_v6  ;;  %v765_v4 = vld [vmem:[#allocation7 + $0x80] sm:$0xff] }
  0xb8   : > { %516 = vmatmul.f32.vlgmr.msrb.gmra.mxu3 %v449_v32  ;;  %v497_v34 = vpop.f32.mrf.mxu3  ;;  %v835_v32 = vld [vmem:[#allocation4 + $0xf8] sm:$0xff] }
  0xb9   : > { %v498_v37 = vadd.f32 %v497_v34, %v420_v33  ;;  %677 = vmatpush.msra.mxu3 %v609_v41  ;;  %v832_v33 = vld [vmem:[#allocation4 + $0xe0] sm:$0xff]  ;;  %v834_v41 = vld [vmem:[#allocation4 + $0xf0] sm:$0xff] }
  0xbb   : > { %1498 = vmatpush.msk.msrb.mxu0 %vm550_vm1, %v498_v37  ;;  %678 = vmatpush.msra.mxu3 %v606_v43  ;;  %v662_v45 = vpop.f32.mrf.mxu2  ;;  %v780_v43 = vld [vmem:[#allocation7 + $0xf8] sm:$0xff] }
  0xbc   : > { %v663_v46 = vadd.f32 %v662_v45, %v614_v42  ;;  %v831_v42 = vld [vmem:[#allocation4 + $0xd8] sm:$0xff]  ;;  %v828_v45 = vld [vmem:[#allocation4 + $0xc0] sm:$0xff]  ;;  %781 = vmatpush.msrb.mxu2 %v780_v43 }
  0xbd   : > { %569 = vmatpush.msrb.mxu0 %v495_v36  ;;  %679 = vmatpush.msra.mxu3 %v603_v44  ;;  %v829_v36 = vld [vmem:[#allocation4 + $0xc8] sm:$0xff]  ;;  %v779_v44 = vld [vmem:[#allocation7 + $0xf0] sm:$0xff] }
  0xbe   : > { %v639_v9 = vpop.f32.mrf.mxu1  ;;  %782 = vmatpush.msrb.mxu2 %v779_v44 }
  0xbf   : > { %680 = vmatpush.msra.mxu3 %v600_v47  ;;  %702 = vmatpush.xpose.msra.mxu0 %v663_v46  ;;  %v640_v11 = vadd.f32 %v639_v9, %v613_v6  ;;  %v778_v46 = vld [vmem:[#allocation7 + $0xe8] sm:$0xff]  ;;  %v836_v6 = vld [vmem:[#allocation4 + $0x100] sm:$0xff] }
  0xc0   : > { %519 = vmatmul.f32.gmra.mxu3 %v452_v38  ;;  %v837_v38 = vld [vmem:[#allocation4 + $0x108] sm:$0xff]  ;;  %783 = vmatpush.msrb.mxu2 %v778_v46  ;;  %v1048_v46 = vld [vmem:[#allocation4 + $0x178] sm:$0xff] }
  0xc1   : > { %804 = vmatpush.msrb.mxu3 %v596_v51 }
  0xc3   : > { %703 = vmatpush.xpose.msra.mxu0 %v660_v48  ;;  %805 = vmatpush.msrb.mxu3 %v595_v52  ;;  %v776_v52 = vld [vmem:[#allocation7 + $0xd8] sm:$0xff] }
  0xc5   : > { %806 = vmatpush.msrb.mxu3 %v594_v54 }
  0xc7   : > { %807 = vmatpush.msrb.mxu3 %v593_v56 }
  0xc8   : > { %1506 = vmatmul.msk.f32.vlgmr.msra.gmra.mxu3 %vm424_vm0, %v1926_v10 }
  0xc9   : > { %808 = vmatpush.msrb.mxu3 %v592_v60  ;;  %v773_v60 = vld [vmem:[#allocation7 + $0xc0] sm:$0xff] }
  0xcb   : > { %809 = vmatpush.msrb.mxu3 %v591_v62  ;;  %v771_v62 = vld [vmem:[#allocation7 + $0xb0] sm:$0xff] }
  0xcd   : > { %810 = vmatpush.msrb.mxu3 %v590_v63  ;;  %v770_v63 = vld [vmem:[#allocation7 + $0xa8] sm:$0xff] }
  0xcf   : > { %811 = vmatpush.msrb.mxu3 %v589_v0  ;;  %v769_v0 = vld [vmem:[#allocation7 + $0xa0] sm:$0xff] }
  0xd0   : > { %1507 = vmatmul.msk.f32.gmra.mxu3 %vm424_vm0, %v1934_v14 }
  0xd1   : > { %812 = vmatpush.msrb.mxu3 %v588_v3  ;;  %v766_v3 = vld [vmem:[#allocation7 + $0x88] sm:$0xff] }
  0xd3   : > { %813 = vmatpush.msrb.mxu3 %v587_v7  ;;  %v833_v7 = vld [vmem:[#allocation4 + $0xe8] sm:$0xff] }
  0xd5   : > { %814 = vmatpush.msrb.mxu3 %v586_v12 }
  0xd7   : > { %815 = vmatpush.msrb.mxu3 %v585_v13 }
  0xd9   : > { %816 = vmatpush.msrb.mxu3 %v584_v15 }
  0xdb   : > { %817 = vmatpush.msrb.mxu3 %v583_v16 }
  0xdd   : > { %818 = vmatpush.msrb.mxu3 %v582_v17 }
  0xdf   : > { %819 = vmatpush.msrb.mxu3 %v581_v18 }
 0x13b   : > { %v517_v49 = vpop.f32.mrf.mxu3 }
 0x13c   : > { %v523_v50 = vmul.f32 1.442695, %v517_v49 }
 0x13e   : > { %1609 = vpow2.f32 %v523_v50  ;;  %v777_v50 = vld [vmem:[#allocation7 + $0xe0] sm:$0xff] }
 0x13f   : > { %784 = vmatpush.msrb.mxu2 %v777_v50 }
 0x141   : > { %785 = vmatpush.msrb.mxu2 %v776_v52 }
 0x143   : > { %v520_v55 = vpop.f32.mrf.mxu3 }
 0x144   : > { %v1610_v57 = vpop.eup %1609  ;;  %v525_v58 = vmul.f32 1.442695, %v520_v55 }
 0x145   : > { %v530_v59 = vmul.f32 %v1610_v57, %v1968_v53 }
 0x146   : > { %1611 = vpow2.f32 %v525_v58  ;;  %v775_v58 = vld [vmem:[#allocation7 + $0xd0] sm:$0xff] }
 0x147   : > { %1499 = vmatmul.msk.f32.vlgmr.msrb.gmra.mxu0 %vm532_vm2, %v530_v59  ;;  %v533_v61 = vsel %vm532_vm2, %v530_v59, 0.0  ;;  %v774_v59 = vld [vmem:[#allocation7 + $0xc8] sm:$0xff]  ;;  %786 = vmatpush.msrb.mxu2 %v775_v58  ;;  %v1009_v58 = vld [vmem:[#allocation7 + $0x170] sm:$0xff] }
 0x148   : > { %534 = vadd.xlane.f32.xlu1 %v533_v61  ;;  %861 = vmatpush.msrb.mxu0 %v837_v38  ;;  %v772_v61 = vld [vmem:[#allocation7 + $0xb8] sm:$0xff] }
 0x149   : > { %787 = vmatpush.msrb.mxu2 %v774_v59 }
 0x14a   : > { %862 = vmatpush.msrb.mxu0 %v834_v41 }
 0x14b   : > { %v682_v19 = vpop.f32.mrf.mxu3  ;;  %788 = vmatpush.msrb.mxu2 %v773_v60  ;;  %v1008_v60 = vld [vmem:[#allocation7 + $0x168] sm:$0xff] }
 0x14c   : > { %v1612_v1 = vpop.eup %1611  ;;  %v683_v22 = vadd.f32 %v682_v19, %v615_v20  ;;  %863 = vmatpush.msrb.mxu0 %v831_v42 }
 0x14d   : > { %v531_v2 = vmul.f32 %v1612_v1, %v1968_v53  ;;  %789 = vmatpush.msrb.mxu2 %v772_v61  ;;  %v768_v1 = vld [vmem:[#allocation7 + $0x98] sm:$0xff]  ;;  %v1007_v61 = vld [vmem:[#allocation7 + $0x160] sm:$0xff] }
 0x14e   : > { %864 = vmatpush.msrb.mxu0 %v828_v45 }
 0x14f   : > { %1500 = vmatmul.msk.f32.gmra.mxu0 %vm532_vm2, %v531_v2  ;;  %v537_v5 = vsel %vm536_vm3, %v531_v2, 0.0  ;;  %790 = vmatpush.msrb.mxu2 %v771_v62  ;;  %v767_v2 = vld [vmem:[#allocation7 + $0x90] sm:$0xff] }
 0x150   : > { %538 = vadd.xlane.f32.xlu1 %v537_v5  ;;  %v839_v5 = vld [vmem:[#allocation4 + $0x118] sm:$0xff] }
 0x151   : > { %791 = vmatpush.msrb.mxu2 %v770_v63  ;;  %v1006_v63 = vld [vmem:[#allocation7 + $0x158] sm:$0xff] }
 0x153   : > { %v685_v21 = vpop.f32.mrf.mxu3  ;;  %792 = vmatpush.msrb.mxu2 %v769_v0 }
 0x154   : > { %v686_v23 = vadd.f32 %v685_v21, %v615_v20 }
 0x155   : > { %793 = vmatpush.msrb.mxu2 %v768_v1 }
 0x156   : > { %1508 = vmatpush.msk.msra.mxu1 %vm550_vm1, %v686_v23 }
 0x157   : > { %704 = vmatmul.f32.vlgmr.msra.gmra.mxu0 %v637_v8  ;;  %794 = vmatpush.msrb.mxu2 %v767_v2  ;;  %v830_v8 = vld [vmem:[#allocation4 + $0xd0] sm:$0xff] }
 0x158   : > { %751 = vmatpush.msra.mxu1 %v683_v22  ;;  %907 = vmatpush.msra.mxu0 %v839_v5  ;;  %v1511_v22 = vld [vmem:[%s2109_s4 + $0x6] sm:$0x7]  ;;  %v1005_v2 = vld [vmem:[#allocation7 + $0x150] sm:$0xff]  ;;  %v1004_v5 = vld [vmem:[#allocation7 + $0x148] sm:$0xff] }
 0x159   : > { %795 = vmatpush.msrb.mxu2 %v766_v3  ;;  %v844_v23 = vperm.slane %v1511_v22, 1  ;;  %v845_v42 = vperm.slane %v1511_v22, 2  ;;  %v2022_v3 = vld [vmem:[%s2109_s4 + $0x9] sm:$0x7] }
 0x15a   : > { %884 = vmatpush.msrb.mxu1 %v838_v31  ;;  %908 = vmatpush.msra.mxu0 %v836_v6  ;;  %v1040_v31 = vld [vmem:[#allocation4 + $0x138] sm:$0xff]  ;;  %v1053_v6 = vperm.slane %v2022_v3, 1 }
 0x15b   : > { %796 = vmatpush.msrb.mxu2 %v765_v4 }
 0x15c   : > { %885 = vmatpush.msrb.mxu1 %v835_v32  ;;  %909 = vmatpush.msra.mxu0 %v833_v7 }
 0x15e   : > { %886 = vmatpush.msrb.mxu1 %v832_v33  ;;  %910 = vmatpush.msra.mxu0 %v830_v8  ;;  %v1047_v33 = vld [vmem:[#allocation4 + $0x170] sm:$0xff] }
 0x15f   : > { %707 = vmatmul.f32.gmra.mxu0 %v640_v11 }
 0x160   : > { %887 = vmatpush.msrb.mxu1 %v829_v36  ;;  %v1044_v36 = vld [vmem:[#allocation4 + $0x158] sm:$0xff] }
 0x167   : > { %1512 = vmatmul.msk.f32.vlgmr.msrb.gmra.mxu0 %vm424_vm0, %v1926_v10 }
 0x16f   : > { %1513 = vmatmul.msk.f32.gmra.mxu0 %vm424_vm0, %v1934_v14 }
 0x177   : > { %1516 = vmatmul.msk.f32.vlgmr.msra.gmra.mxu0 %vm424_vm0, %v1926_v10 }
 0x17f   : > { %1517 = vmatmul.msk.f32.gmra.mxu0 %vm424_vm0, %v1934_v14 }
 0x1bb   : > { %v535_v24 = vpop.xlane.xlu1 %534 }
 0x1bc   : > { %v540_v25 = vadd.f32 1e-08, %v535_v24 }
 0x1be   : > { %1613 = vrcp.f32 %v540_v25 }
 0x1c3   : > { %v539_v26 = vpop.xlane.xlu1 %538 }
 0x1c4   : > { %v1614_v27 = vpop.eup %1613  ;;  %v541_v28 = vadd.f32 1e-08, %v539_v26  ;;  %v571_v29 = vpop.f32.mrf.mxu0 }
 0x1c5   : > { %v1979_v30 = vmul.f32 %v1614_v27, %v571_v29  ;;  %v843_v27 = vperm.slane %v1511_v22, 0  ;;  %v1043_v29 = vld [vmem:[#allocation4 + $0x150] sm:$0xff]  ;;  %v999_v22 = vld [vmem:[#allocation7 + $0x120] sm:$0xff] }
 0x1c6   : > { %1615 = vrcp.f32 %v541_v28  ;;  %v1046_v28 = vld [vmem:[#allocation4 + $0x168] sm:$0xff] }
 0x1c7   : > { %820 = vmatmul.f32.vlgmr.msrb.gmra.mxu3 %v1979_v30  ;;  %1070 = vmatpush.msrb.mxu0 %v1046_v28 }
 0x1c9   : > { %1071 = vmatpush.msrb.mxu0 %v1043_v29 }
 0x1cb   : > { %1072 = vmatpush.msrb.mxu0 %v1040_v31 }
 0x1cc   : > { %v1616_v34 = vpop.eup %1615  ;;  %v574_v35 = vpop.f32.mrf.mxu0 }
 0x1cd   : > { %v578_v37 = vmul.f32 %v1616_v34, %v574_v35  ;;  %v1037_v35 = vld [vmem:[#allocation4 + $0x120] sm:$0xff] }
 0x1ce   : > { %1073 = vmatpush.msrb.mxu0 %v1037_v35  ;;  %v1219_v35 = vld [vmem:[#allocation7 + $0x1f8] sm:$0xff] }
 0x1cf   : > { %580 = vst [vmem:[#allocation2] sm:$0x3] %v578_v37  ;;  %823 = vmatmul.f32.gmra.mxu3 %v578_v37  ;;  %v1041_v37 = vld [vmem:[#allocation4 + $0x140] sm:$0xff]  ;;  %1522 = vmatmul.msk.f32.vlgmr.msrb.gmra.mxu0 %vm424_vm0, %v1926_v10 }
 0x1d4   : > { %v705_v39 = vpop.f32.mrf.mxu0 }
 0x1d5   : > { %v711_v40 = vmul.f32 1.442695, %v705_v39  ;;  %v1038_v39 = vld [vmem:[#allocation4 + $0x128] sm:$0xff] }
 0x1d7   : > { %1617 = vpow2.f32 %v711_v40  ;;  %1523 = vmatmul.msk.f32.gmra.mxu0 %vm424_vm0, %v1934_v14 }
 0x1dc   : > { %v708_v47 = vpop.f32.mrf.mxu0 }
 0x1dd   : > { %v1618_v48 = vpop.eup %1617  ;;  %v713_v49 = vmul.f32 1.442695, %v708_v47  ;;  %v1045_v47 = vld [vmem:[#allocation4 + $0x160] sm:$0xff] }
 0x1de   : > { %v715_v51 = vmul.f32 %v1618_v48, %v1968_v53  ;;  %v1042_v48 = vld [vmem:[#allocation4 + $0x148] sm:$0xff] }
 0x1df   : > { %1619 = vpow2.f32 %v713_v49  ;;  %v1039_v49 = vld [vmem:[#allocation4 + $0x130] sm:$0xff] }
 0x1e0   : > { %1509 = vmatmul.msk.f32.vlgmr.msra.gmra.mxu1 %vm532_vm2, %v715_v51  ;;  %v717_v54 = vsel %vm532_vm2, %v715_v51, 0.0 }
 0x1e1   : > { %718 = vadd.xlane.f32.xlu0 %v717_v54 }
 0x1e4   : > { %v866_v26 = vpop.f32.mrf.mxu0 }
 0x1e5   : > { %v1620_v55 = vpop.eup %1619  ;;  %v867_v34 = vadd.f32 %v866_v26, %v843_v27 }
 0x1e6   : > { %v716_v56 = vmul.f32 %v1620_v55, %v1968_v53 }
 0x1e8   : > { %1510 = vmatmul.msk.f32.gmra.mxu1 %vm532_vm2, %v716_v56  ;;  %v720_v57 = vsel %vm536_vm3, %v716_v56, 0.0 }
 0x1e9   : > { %721 = vadd.xlane.f32.xlu0 %v720_v57  ;;  %v1010_v57 = vld [vmem:[#allocation7 + $0x178] sm:$0xff] }
 0x1ea   : > { %1011 = vmatpush.msra.mxu3 %v1010_v57 }
 0x1ec   : > { %v869_v38 = vpop.f32.mrf.mxu0  ;;  %1012 = vmatpush.msra.mxu3 %v1009_v58  ;;  %v1215_v58 = vld [vmem:[#allocation7 + $0x1d8] sm:$0xff] }
 0x1ed   : > { %v870_v40 = vadd.f32 %v869_v38, %v843_v27 }
 0x1ee   : > { %1013 = vmatpush.msra.mxu3 %v1008_v60  ;;  %v1213_v60 = vld [vmem:[#allocation7 + $0x1c8] sm:$0xff] }
 0x1f0   : > { %1514 = vmatmul.msk.f32.vlgmr.msrb.gmra.mxu1 %vm424_vm0, %v1926_v10  ;;  %1014 = vmatpush.msra.mxu3 %v1007_v61  ;;  %v1212_v61 = vld [vmem:[#allocation7 + $0x1c0] sm:$0xff] }
 0x1f2   : > { %1015 = vmatpush.msra.mxu3 %v1006_v63  ;;  %v1210_v63 = vld [vmem:[#allocation7 + $0x1b0] sm:$0xff] }
 0x1f4   : > { %v912_v41 = vpop.f32.mrf.mxu0  ;;  %1016 = vmatpush.msra.mxu3 %v1005_v2  ;;  %v1206_v2 = vld [vmem:[#allocation7 + $0x190] sm:$0xff] }
 0x1f5   : > { %v913_v44 = vadd.f32 %v912_v41, %v845_v42  ;;  %v1216_v41 = vld [vmem:[#allocation7 + $0x1e0] sm:$0xff] }
 0x1f6   : > { %1017 = vmatpush.msra.mxu3 %v1004_v5 }
 0x1f8   : > { %1515 = vmatmul.msk.f32.gmra.mxu1 %vm424_vm0, %v1934_v14 }
 0x1fc   : > { %v915_v43 = vpop.f32.mrf.mxu0 }
 0x1fd   : > { %v916_v45 = vadd.f32 %v915_v43, %v845_v42 }
 0x1ff   : > { %1518 = vmatpush.msk.msra.mxu2 %vm550_vm1, %v916_v45  ;;  %v1054_v45 = vperm.slane %v2022_v3, 2 }
 0x201   : > { %981 = vmatpush.msra.mxu2 %v913_v44 }
 0x254   : > { %v719_v9 = vpop.xlane.xlu0 %718 }
 0x255   : > { %v723_v11 = vadd.f32 1e-08, %v719_v9  ;;  %v1075_v9 = vpop.f32.mrf.mxu0 }
 0x257   : > { %1621 = vrcp.f32 %v723_v11  ;;  %v1052_v11 = vperm.slane %v2022_v3, 0  ;;  %v1205_v3 = vld [vmem:[#allocation7 + $0x188] sm:$0xff] }
 0x25c   : > { %v722_v12 = vpop.xlane.xlu0 %721 }
 0x25d   : > { %v1622_v13 = vpop.eup %1621  ;;  %v724_v15 = vadd.f32 1e-08, %v722_v12  ;;  %v753_v16 = vpop.f32.mrf.mxu1 }
 0x25e   : > { %v2000_v17 = vmul.f32 %v1622_v13, %v753_v16  ;;  %v1076_v13 = vadd.f32 %v1075_v9, %v1052_v11 }
 0x25f   : > { %1623 = vrcp.f32 %v724_v15  ;;  %v1078_v15 = vpop.f32.mrf.mxu0 }
 0x260   : > { %797 = vmatmul.f32.vlgmr.msrb.gmra.mxu2 %v2000_v17  ;;  %v1079_v16 = vadd.f32 %v1078_v15, %v1052_v11 }
 0x261   : > { %1116 = vmatpush.msrb.mxu2 %v1048_v46 }
 0x263   : > { %1117 = vmatpush.msrb.mxu2 %v1045_v47 }
 0x265   : > { %v1624_v18 = vpop.eup %1623  ;;  %v756_v19 = vpop.f32.mrf.mxu1  ;;  %1118 = vmatpush.msrb.mxu2 %v1042_v48 }
 0x266   : > { %v760_v20 = vmul.f32 %v1624_v18, %v756_v19  ;;  %v1003_v18 = vld [vmem:[#allocation7 + $0x140] sm:$0xff]  ;;  %v1002_v19 = vld [vmem:[#allocation7 + $0x138] sm:$0xff] }
 0x267   : > { %1119 = vmatpush.msrb.mxu2 %v1039_v49  ;;  %1018 = vmatpush.msra.mxu3 %v1003_v18  ;;  %v821_v18 = vpop.f32.mrf.mxu3 }
 0x268   : > { %763 = vst [vmem:[#allocation2 + $0x10] sm:$0x3] %v760_v20  ;;  %800 = vmatmul.f32.gmra.mxu2 %v760_v20  ;;  %v1001_v20 = vld [vmem:[#allocation7 + $0x130] sm:$0xff] }
 0x269   : > { %1019 = vmatpush.msra.mxu3 %v1002_v19 }
 0x26b   : > { %1020 = vmatpush.msra.mxu3 %v1001_v20 }
 0x26d   : > { %v889_v21 = vpop.f32.mrf.mxu1 }
 0x26e   : > { %v890_v32 = vadd.f32 %v889_v21, %v844_v23  ;;  %v1000_v21 = vld [vmem:[#allocation7 + $0x128] sm:$0xff] }
 0x26f   : > { %1021 = vmatpush.msra.mxu3 %v1000_v21  ;;  %v824_v19 = vpop.f32.mrf.mxu3 }
 0x271   : > { %1022 = vmatpush.msra.mxu3 %v999_v22 }
 0x275   : > { %v892_v24 = vpop.f32.mrf.mxu1 }
 0x276   : > { %v893_v25 = vadd.f32 %v892_v24, %v844_v23  ;;  %v997_v23 = vld [vmem:[#allocation7 + $0x110] sm:$0xff]  ;;  %v996_v24 = vld [vmem:[#allocation7 + $0x108] sm:$0xff] }
 0x278   : > { %932 = vmatpush.xpose.msra.mxu1 %v893_v25  ;;  %v995_v25 = vld [vmem:[#allocation7 + $0x100] sm:$0xff] }
 0x27c   : > { %933 = vmatpush.xpose.msra.mxu1 %v890_v32 }
 0x27f   : > { %934 = vmatmul.f32.vlgmr.msra.gmra.mxu1 %v867_v34 }
 0x280   : > { %1093 = vmatpush.msrb.mxu1 %v1047_v33 }
 0x282   : > { %1094 = vmatpush.msrb.mxu1 %v1044_v36  ;;  %v1218_v36 = vld [vmem:[#allocation7 + $0x1f0] sm:$0xff] }
 0x284   : > { %1095 = vmatpush.msrb.mxu1 %v1041_v37 }
 0x286   : > { %1096 = vmatpush.msrb.mxu1 %v1038_v39  ;;  %v1217_v39 = vld [vmem:[#allocation7 + $0x1e8] sm:$0xff] }
 0x287   : > { %937 = vmatmul.f32.gmra.mxu1 %v870_v40 }
 0x28f   : > { %1524 = vmatmul.msk.f32.vlgmr.msrb.gmra.mxu1 %vm424_vm0, %v1926_v10 }
 0x297   : > { %1525 = vmatmul.msk.f32.gmra.mxu1 %vm424_vm0, %v1934_v14 }
 0x2fc   : > { %v935_v50 = vpop.f32.mrf.mxu1 }
 0x2fd   : > { %v941_v51 = vmul.f32 1.442695, %v935_v50 }
 0x2ff   : > { %1625 = vpow2.f32 %v941_v51 }
 0x304   : > { %v938_v52 = vpop.f32.mrf.mxu1 }
 0x305   : > { %v1626_v54 = vpop.eup %1625  ;;  %v943_v55 = vmul.f32 1.442695, %v938_v52 }
 0x306   : > { %v945_v56 = vmul.f32 %v1626_v54, %v1968_v53 }
 0x307   : > { %1627 = vpow2.f32 %v943_v55 }
 0x308   : > { %1519 = vmatmul.msk.f32.vlgmr.msra.gmra.mxu2 %vm532_vm2, %v945_v56  ;;  %v947_v59 = vsel %vm532_vm2, %v945_v56, 0.0 }
 0x309   : > { %948 = vadd.xlane.f32.xlu2 %v947_v59  ;;  %1220 = vmatpush.msra.mxu2 %v1219_v35  ;;  %v1214_v59 = vld [vmem:[#allocation7 + $0x1d0] sm:$0xff] }
 0x30b   : > { %1221 = vmatpush.msra.mxu2 %v1218_v36 }
 0x30c   : > { %v1098_v62 = vpop.f32.mrf.mxu1 }
 0x30d   : > { %v1628_v0 = vpop.eup %1627  ;;  %v1099_v12 = vadd.f32 %v1098_v62, %v1053_v6  ;;  %1222 = vmatpush.msra.mxu2 %v1217_v39  ;;  %v1211_v62 = vld [vmem:[#allocation7 + $0x1b8] sm:$0xff] }
 0x30e   : > { %v946_v1 = vmul.f32 %v1628_v0, %v1968_v53  ;;  %v1209_v0 = vld [vmem:[#allocation7 + $0x1a8] sm:$0xff] }
 0x30f   : > { %1223 = vmatpush.msra.mxu2 %v1216_v41 }
 0x310   : > { %1520 = vmatmul.msk.f32.gmra.mxu2 %vm532_vm2, %v946_v1  ;;  %v950_v4 = vsel %vm536_vm3, %v946_v1, 0.0  ;;  %v1207_v1 = vld [vmem:[#allocation7 + $0x198] sm:$0xff] }
 0x311   : > { %951 = vadd.xlane.f32.xlu0 %v950_v4  ;;  %1224 = vmatpush.msra.mxu2 %v1215_v58  ;;  %v1204_v4 = vld [vmem:[#allocation7 + $0x180] sm:$0xff] }
 0x313   : > { %1225 = vmatpush.msra.mxu2 %v1214_v59 }
 0x314   : > { %v1101_v7 = vpop.f32.mrf.mxu1 }
 0x315   : > { %v1102_v8 = vadd.f32 %v1101_v7, %v1053_v6  ;;  %1226 = vmatpush.msra.mxu2 %v1213_v60 }
 0x317   : > { %1141 = vmatpush.xpose.msra.mxu0 %v1102_v8  ;;  %1227 = vmatpush.msra.mxu2 %v1212_v61 }
 0x318   : > { %1526 = vmatmul.msk.f32.vlgmr.msrb.gmra.mxu2 %vm424_vm0, %v1926_v10  ;;  %v998_v10 = vld [vmem:[#allocation7 + $0x118] sm:$0xff] }
 0x319   : > { %1023 = vmatpush.msra.mxu3 %v998_v10  ;;  %1228 = vmatpush.msra.mxu2 %v1211_v62  ;;  %v1606_v10 = vld [vmem:[%s2111_s6] ss:$0 sm:$0xff] }
 0x31b   : > { %1142 = vmatpush.xpose.msra.mxu0 %v1099_v12  ;;  %1024 = vmatpush.msra.mxu3 %v997_v23 }
 0x31c   : > { %1229 = vmatpush.msra.mxu2 %v1210_v63 }
 0x31d   : > { %1025 = vmatpush.msra.mxu3 %v996_v24 }
 0x31e   : > { %1143 = vmatmul.f32.vlgmr.msra.gmra.mxu0 %v1076_v13  ;;  %1230 = vmatpush.msra.mxu2 %v1209_v0 }
 0x31f   : > { %1026 = vmatpush.msra.mxu3 %v995_v25 }
 0x320   : > { %1527 = vmatmul.msk.f32.gmra.mxu2 %vm424_vm0, %v1934_v14  ;;  %v2032_v14 = vpop.f32.mrf.mxu2 }
 0x321   : > { %v822_v21 = vadd.f32 %v821_v18, %v2032_v14 }
 0x326   : > { %1146 = vmatmul.f32.gmra.mxu0 %v1079_v16 }
 0x328   : > { %v2034_v28 = vpop.f32.mrf.mxu2 }
 0x37c   : > { %v949_v26 = vpop.xlane.xlu2 %948 }
 0x37d   : > { %v953_v27 = vadd.f32 1e-08, %v949_v26 }
 0x37f   : > { %1629 = vrcp.f32 %v953_v27  ;;  %v825_v27 = vadd.f32 %v824_v19, %v2034_v28  ;;  %v1789_v28 = vmov 0  }
 0x380   : > { %1603 = vset.pattern.permute.xlu2 %v1789_v28  ;;  %1602 = vset.pattern.permute.xlu1 %v1789_v28 }
 0x381   : > { %1604 = vset.pattern.permute.xlu0 %v1789_v28 }
 0x384   : > { %v952_v29 = vpop.xlane.xlu0 %951 }
 0x385   : > { %v954_v31 = vadd.f32 1e-08, %v952_v29  ;;  %v1630_v32 = vpop.eup %1629 }
 0x387   : > { %1631 = vrcp.f32 %v954_v31 }
 0x38b   : > { %v983_v33 = vpop.f32.mrf.mxu2 }
 0x38c   : > { %v2036_v34 = vmul.f32 %v1630_v32, %v983_v33  ;;  %v1607_v32 = vld [vmem:[%s2112_s7] ss:$0 sm:$0xff] }
 0x38d   : > { %v1632_v37 = vpop.eup %1631 }
 0x38e   : > { %1027 = vmatmul.f32.vlgmr.msra.gmra.mxu3 %v2036_v34 }
 0x393   : > { %v986_v38 = vpop.f32.mrf.mxu2 }
 0x394   : > { %v990_v40 = vmul.f32 %v1632_v37, %v986_v38 }
 0x396   : > { %993 = vst [vmem:[#allocation2 + $0x20] sm:$0x3] %v990_v40  ;;  %1030 = vmatmul.f32.gmra.mxu3 %v990_v40  ;;  %v1608_v40 = vld [vmem:[#allocation3] ss:$0 sm:$0xff] }
 0x39b   : > { %v1121_v42 = vpop.f32.mrf.mxu2  ;;  %v1144_v43 = vpop.f32.mrf.mxu0 }
 0x39c   : > { %v1150_v44 = vmul.f32 1.442695, %v1144_v43  ;;  %v1122_v52 = vadd.f32 %v1121_v42, %v1054_v45 }
 0x39e   : > { %1633 = vpow2.f32 %v1150_v44 }
 0x3a3   : > { %v1124_v46 = vpop.f32.mrf.mxu2  ;;  %v1147_v47 = vpop.f32.mrf.mxu0 }
 0x3a4   : > { %v1634_v48 = vpop.eup %1633  ;;  %v1125_v49 = vadd.f32 %v1124_v46, %v1054_v45  ;;  %v1152_v50 = vmul.f32 1.442695, %v1147_v47  ;;  %v1274_v45 = vld [vmem:[%s400_s23] sm:$0xff] }
 0x3a5   : > { %v1154_v51 = vmul.f32 %v1634_v48, %v1968_v53 }
 0x3a6   : > { %1635 = vpow2.f32 %v1152_v50  ;;  %1528 = vmatpush.msk.msra.mxu1 %vm550_vm1, %v1125_v49  ;;  %v1275_v50 = vld [vmem:[%s400_s23 + $0x8] sm:$0x3] }
 0x3a7   : > { %v1156_v54 = vsel %vm532_vm2, %v1154_v51, 0.0 }
 0x3a8   : > { %1190 = vmatpush.msra.mxu1 %v1122_v52  ;;  %1157 = vadd.xlane.f32.xlu2 %v1156_v54 }
 0x3a9   : > { %1529 = vmatmul.msk.f32.vlgmr.msra.gmra.mxu1 %vm532_vm2, %v1154_v51 }
 0x3ac   : > { %v1636_v55 = vpop.eup %1635 }
 0x3ad   : > { %v1155_v56 = vmul.f32 %v1636_v55, %v1968_v53  ;;  %v1208_v53 = vld [vmem:[#allocation7 + $0x1a0] sm:$0xff] }
 0x3ae   : > { %1231 = vmatpush.msra.mxu2 %v1208_v53 }
 0x3af   : > { %v1159_v57 = vsel %vm536_vm3, %v1155_v56, 0.0 }
 0x3b0   : > { %1160 = vadd.xlane.f32.xlu1 %v1159_v57  ;;  %1232 = vmatpush.msra.mxu2 %v1207_v1  ;;  %v1292_v1 = vld [vmem:[#allocation2] sm:$0x3] }
 0x3b1   : > { %1530 = vmatmul.msk.f32.gmra.mxu1 %vm532_vm2, %v1155_v56 }
 0x3b2   : > { %1233 = vmatpush.msra.mxu2 %v1206_v2  ;;  %v1314_v2 = vld [vmem:[#allocation2 + $0x10] sm:$0x3] }
 0x3b4   : > { %1234 = vmatpush.msra.mxu2 %v1205_v3  ;;  %v1326_v3 = vld [vmem:[#allocation2 + $0x20] sm:$0x3] }
 0x3b6   : > { %1235 = vmatpush.msra.mxu2 %v1204_v4 }
 0x411   : > { %v1028_v20 = vpop.f32.mrf.mxu3 }
 0x412   : > { %v1034_v22 = vadd.f32 %v1028_v20, %v822_v21 }
 0x419   : > { %v1031_v26 = vpop.f32.mrf.mxu3 }
 0x41a   : > { %v1035_v29 = vadd.f32 %v1031_v26, %v825_v27 }
 0x41b   : > { %v1158_v5 = vpop.xlane.xlu2 %1157 }
 0x41c   : > { %v1162_v6 = vadd.f32 1e-08, %v1158_v5 }
 0x41e   : > { %1637 = vrcp.f32 %v1162_v6 }
 0x423   : > { %v1161_v7 = vpop.xlane.xlu1 %1160 }
 0x424   : > { %v1638_v8 = vpop.eup %1637  ;;  %v1163_v9 = vadd.f32 1e-08, %v1161_v7 }
 0x426   : > { %1639 = vrcp.f32 %v1163_v9  ;;  %v1192_v11 = vpop.f32.mrf.mxu1 }
 0x427   : > { %v2047_v12 = vmul.f32 %v1638_v8, %v1192_v11 }
 0x429   : > { %1236 = vmatmul.f32.vlgmr.msra.gmra.mxu2 %v2047_v12 }
 0x42c   : > { %v1640_v13 = vpop.eup %1639 }
 0x42e   : > { %v1195_v15 = vpop.f32.mrf.mxu1 }
 0x42f   : > { %v1199_v16 = vmul.f32 %v1640_v13, %v1195_v15 }
 0x431   : > { %1202 = vst [vmem:[#allocation2 + $0x38] sm:$0x3] %v1199_v16  ;;  %1239 = vmatmul.f32.gmra.mxu2 %v1199_v16 }
 0x438   : > { %v1338_v5 = vld [vmem:[#allocation2 + $0x38] sm:$0x3] }
 0x4ac   : > { %v1237_v23 = vpop.f32.mrf.mxu2 }
 0x4ad   : > { %v1243_v24 = vadd.f32 %v1237_v23, %v1034_v22 }
 0x4af   : > { %v1249_v25 = vadd.f32 %v1606_v10, %v1243_v24 }
 0x4b1   : > { %1641 = vtanh.f32 %v1249_v25 }
 0x4b4   : > { %v1240_v31 = vpop.f32.mrf.mxu2 }
 0x4b5   : > { %v1244_v33 = vadd.f32 %v1240_v31, %v1035_v29 }
 0x4b7   : > { %v1642_v14 = vpop.eup %1641  ;;  %v1250_v35 = vadd.f32 %v1606_v10, %v1244_v33 }
 0x4b8   : > { %v1257_v36 = vmul.f32 %v1642_v14, %v1607_v32 }
 0x4b9   : > { %1643 = vtanh.f32 %v1250_v35 }
 0x4ba   : > { %1259 = vadd.xlane.f32.xlu2 %v1257_v36 }
 0x4bf   : > { %v1644_v37 = vpop.eup %1643 }
 0x4c0   : > { %v1258_v38 = vmul.f32 %v1644_v37, %v1607_v32 }
 0x4c2   : > { %v1261_v39 = vsel %vm550_vm1, %v1258_v38, 0.0 }
 0x4c3   : > { %1262 = vadd.xlane.f32.xlu0 %v1261_v39 }
 0x52d   : > { %v1260_v41 = vpop.xlane.xlu2 %1259 }
 0x52e   : > { %v1268_v42 = vadd.f32 %v1608_v40, %v1260_v41 }
 0x530   : > { %v1270_v43 = vmul.f32 1.442695, %v1268_v42 }
 0x532   : > { %1645 = vpow2.f32 %v1270_v43 }
 0x536   : > { %v1263_v44 = vpop.xlane.xlu0 %1262 }
 0x537   : > { %v1269_v46 = vadd.f32 %v1608_v40, %v1263_v44 }
 0x538   : > { %v1646_v47 = vpop.eup %1645 }
 0x539   : > { %v1272_v48 = vmul.f32 1.442695, %v1269_v46  ;;  %v1276_v49 = vmul.f32 %v1646_v47, %v1274_v45 }
 0x53b   : > { %1647 = vpow2.f32 %v1272_v48  ;;  %1295 = vperm.xlu2 %1603, %v1276_v49   ;;  %v1279_v54 = vsel %vm1278_vm4, %v1276_v49, 0.0 }
 0x541   : > { %v1648_v51 = vpop.eup %1647 }
 0x542   : > { %v1277_v52 = vmul.f32 %v1648_v51, %v1275_v50 }
 0x544   : > { %1300 = vperm.xlu1 %1602, %v1277_v52   ;;  %v1281_v55 = vsel %vm1280_vm5, %v1277_v52, 0.0 }
 0x545   : > { %v1282_v56 = vadd.f32 %v1281_v55, %v1279_v54 }
 0x547   : > { %v1283_v57 = vrot.slane %v1282_v56, 4 }
 0x549   : > { %v1284_v58 = vadd.f32 %v1283_v57, %v1282_v56 }
 0x54b   : > { %v1285_v59 = vrot.slane %v1284_v58, 2 }
 0x54d   : > { %v1286_v60 = vadd.f32 %v1285_v59, %v1284_v58 }
 0x54f   : > { %v1287_v61 = vrot.slane %v1286_v60, 1 }
 0x551   : > { %v1288_v62 = vadd.f32 %v1287_v61, %v1286_v60 }
 0x553   : > { %v1289_v63 = vadd.f32 1e-08, %v1288_v62 }
 0x555   : > { %1649 = vrcp.f32 %v1289_v63 }
 0x55b   : > { %v1650_v0 = vpop.eup %1649 }
 0x55c   : > { %1356 = vperm.xlu0 %1604, %v1650_v0  }
 0x595   : > { %v1296_v53 = vpop.permute.xlu2 %1295 }
 0x596   : > { %v1303_v11 = vmul.f32 %v1296_v53, %v1979_v30  ;;  %v1315_v13 = vmul.f32 %v1296_v53, %v2000_v17  ;;  %v1327_v15 = vmul.f32 %v1296_v53, %v2036_v34  ;;  %v1339_v16 = vmul.f32 %v1296_v53, %v2047_v12 }
 0x5b6   : > { %v1301_v4 = vpop.permute.xlu1 %1300 }
 0x5b7   : > { %v1304_v6 = vmul.f32 %v1301_v4, %v1292_v1  ;;  %v1316_v7 = vmul.f32 %v1314_v2, %v1301_v4  ;;  %v1328_v8 = vmul.f32 %v1326_v3, %v1301_v4  ;;  %v1340_v9 = vmul.f32 %v1338_v5, %v1301_v4 }
 0x5b9   : > { %v1305_v18 = vsel %vm550_vm1, %v1304_v6, 0.0  ;;  %v1317_v19 = vsel %vm550_vm1, %v1316_v7, 0.0  ;;  %v1329_v20 = vsel %vm550_vm1, %v1328_v8, 0.0  ;;  %v1341_v21 = vsel %vm550_vm1, %v1340_v9, 0.0 }
 0x5ba   : > { %v1306_v22 = vadd.f32 %v1305_v18, %v1303_v11  ;;  %v1318_v10 = vadd.f32 %v1317_v19, %v1315_v13  ;;  %v1330_v23 = vadd.f32 %v1329_v20, %v1327_v15  ;;  %v1342_v24 = vadd.f32 %v1341_v21, %v1339_v16 }
 0x5bc   : > { %v1307_v30 = vrot.slane %v1306_v22, 4  ;;  %v1319_v25 = vrot.slane %v1318_v10, 4  ;;  %v1331_v17 = vrot.slane %v1330_v23, 4  ;;  %v1343_v26 = vrot.slane %v1342_v24, 4 }
 0x5be   : > { %v1308_v34 = vadd.f32 %v1307_v30, %v1306_v22  ;;  %v1320_v27 = vadd.f32 %v1319_v25, %v1318_v10  ;;  %v1332_v12 = vadd.f32 %v1331_v17, %v1330_v23  ;;  %v1344_v29 = vadd.f32 %v1343_v26, %v1342_v24 }
 0x5c0   : > { %v1309_v31 = vrot.slane %v1308_v34, 2  ;;  %v1321_v32 = vrot.slane %v1320_v27, 2  ;;  %v1333_v33 = vrot.slane %v1332_v12, 2  ;;  %v1345_v14 = vrot.slane %v1344_v29, 2 }
 0x5c2   : > { %v1310_v35 = vadd.f32 %v1309_v31, %v1308_v34  ;;  %v1322_v36 = vadd.f32 %v1321_v32, %v1320_v27  ;;  %v1334_v37 = vadd.f32 %v1333_v33, %v1332_v12  ;;  %v1346_v40 = vadd.f32 %v1345_v14, %v1344_v29 }
 0x5c4   : > { %v1311_v38 = vrot.slane %v1310_v35, 1  ;;  %v1323_v39 = vrot.slane %v1322_v36, 1  ;;  %v1335_v28 = vrot.slane %v1334_v37, 1  ;;  %v1347_v45 = vrot.slane %v1346_v40, 1 }
 0x5c6   : > { %v1312_v41 = vadd.f32 %v1311_v38, %v1310_v35  ;;  %v1324_v42 = vadd.f32 %v1323_v39, %v1322_v36  ;;  %v1336_v43 = vadd.f32 %v1335_v28, %v1334_v37  ;;  %v1348_v47 = vadd.f32 %v1347_v45, %v1346_v40 }
 0x5c8   : > { %v1350_v44 = vsel %vm1349_vm6, %v1312_v41, %v1324_v42 }
 0x5c9   : > { %v1351_v46 = vsel %vm550_vm1, %v1350_v44, %v1336_v43 }
 0x5ca   : > { %v1353_v49 = vsel %vm1352_vm7, %v1351_v46, %v1348_v47 }
 0x5ce   : > { %v1357_v48 = vpop.permute.xlu0 %1356 }
 0x5cf   : > { %v1359_v50 = vmul.f32 %v1357_v48, %v1353_v49 }
 0x5d1   : > { %1360 = vst [vmem:[%s387_s29] sm:$0xf] %v1359_v50 }
 0x5d2   : > { %1738 = shalt.err (!%p1735_p8)
}
 0x5d3   : > { %1545 = dma.vmem_to_hbm [thread:$0]  (%p1881_p5), %s1375_s30, 64, %s1377_s10, %s1362_s8  }
 0x5d4 PF: > { %p1562_p9 = scmp.ge.s32.totalorder %s1781_s14, 2  ;;  %s1388_s25 = sand.u32 1, %s1769_s11  }
 0x5d5   : > { %s1389_s27 = scalar_lea.sflag [#allocation6], %s1388_s25 }
 0x5d6   : > { %p1555_p10 = pnand %p1562_p9, %p1885_p6 }
 0x5d8   : > { %p1556_p11 = pneg %p1555_p10 }
 0x5da   : > { %1764 = dma.done.wait (%p1556_p11), %s1389_s27, 64  }
 0x5db   : > { %1766 = vsyncadd (%p1556_p11), %s1389_s27, 4294967232  ;;  %p23_p12 = scmp.ge.s32.totalorder %s1868_s16, 4   ;;  %s2118_s11 = smov %s1773_s12 }
 0x5dc   : > { %s2119_s12 = smov %s1777_s13  ;;  %s2120_s13 = smov %s1879_s19 }
 0x5dd   : > { %s2121_s14 = smov %s1868_s16  ;;  %25 = sbr.rel (!%p23_p12) target bundleno = 8 (0x8), region = 118 }
 0x5e2   :  { %1395 = vsyncpa [#allocation5], 1 }
 0x5e3   :  { %1397 = vsyncpa [#allocation5 + $0x1], 1 }
 0x5e4   :  { %1398 = vsyncpa [#allocation8], 1 }
 0x5e5   :  { %1399 = vsyncpa [#allocation6], 1 }
 0x5e6   :  { %1401 = vsyncpa [#allocation6 + $0x1], 1 }

</bundles_post_ra>
